<compile_context>
chip_gen: v7x
topology: tpu7x:2x2x1
jax: 0.10.0
libtpu: 0.0.40
codegen_flags: <defaults>
</compile_context>

<pallas_src>
import functools
import numpy as np
import jax
import jax.numpy as jnp
from jax.experimental import pallas as pl
from jax.experimental.pallas import tpu as pltpu


# ----------------------------- kernel -------------------------------------------------------

def _fused_head_resize_kernel(p_ref, wconv_ref, wcls_ref, rt_ref, o_ref, logits_sc,
                              *, n_pix_blocks):
    # conv3x3 with BN scale AND bias folded into one augmented matmul (ones row in patches):
    # (hidden, K+1) @ (K+1, pb) -> (hidden, pb), f32 accumulation. Then ReLU.
    y = jnp.dot(wconv_ref[...], p_ref[0], preferred_element_type=jnp.float32)
    y = jnp.maximum(y, 0.0)

    # per-pixel inverse L2 norm over the hidden channels (sublane axis), EUP rsqrt.
    ssq = jnp.sum(y * y, axis=0, keepdims=True)                  # (1, pb)
    inv = jax.lax.rsqrt(ssq + 1e-20)                             # ~= 1 / (norm + 1e-10)

    # cosine classifier (10x folded). Normalization deferred past the matmul so the per-pixel
    # scale multiplies the small (nc, pb) tile instead of the (hidden, pb) activation.
    z = jnp.dot(wcls_ref[...], y.astype(wcls_ref.dtype),
                preferred_element_type=jnp.float32)              # (nc, pb)
    logits = z * inv                                             # (nc, pb), f32

    if n_pix_blocks == 1:
        # whole image in one pixel block: resize straight away, no scratch round trip.
        o_ref[0] = jnp.dot(logits, rt_ref[...], preferred_element_type=jnp.float32)
    else:
        j = pl.program_id(1)
        pb = logits.shape[-1]
        col0 = pl.multiple_of(j * pb, pb)
        logits_sc[:, pl.ds(col0, pb)] = logits

        @pl.when(j == pl.num_programs(1) - 1)
        def _():
            # fused bilinear resize: (nc, H*W) @ (H*W, Hout*Wout) -> lane-dense output store.
            o_ref[0] = jnp.dot(logits_sc[...], rt_ref[...],
                               preferred_element_type=jnp.float32)


# ----------------------------- glue helpers -------------------------------------------------

def _linear_resize_matrix(n_out, n_in):
    """Row matrix reproducing F.interpolate(mode='bilinear', align_corners=False) on one axis."""
    scale = n_in / n_out
    o = np.arange(n_out, dtype=np.float64)
    src = scale * (o + 0.5) - 0.5
    src = np.maximum(src, 0.0)
    i0 = np.minimum(np.floor(src).astype(np.int64), n_in - 1)
    i1 = np.minimum(i0 + 1, n_in - 1)
    frac = src - i0
    R = np.zeros((n_out, n_in), dtype=np.float32)
    R[np.arange(n_out), i0] += (1.0 - frac).astype(np.float32)
    R[np.arange(n_out), i1] += frac.astype(np.float32)
    return R


def _im2col_3x3_cm(x_nchw):
    """Channel-major im2col of a zero-padded NCHW input with an appended ones row (for the
    folded BN bias). Returns (B, 9*Cin + 1, H*W) with k = (dh*3+dw)*Cin + ci and pixel = h*W+w.
    Built directly in channel-major order: no (B,HW,9C)->(B,9C,HW) HBM transpose pass."""
    B, C, H, W = x_nchw.shape
    xp = jnp.pad(x_nchw, ((0, 0), (0, 0), (1, 1), (1, 1)))
    cols = [xp[:, :, dh:dh + H, dw:dw + W].reshape(B, C, H * W)
            for dh in range(3) for dw in range(3)]
    cols.append(jnp.ones((B, 1, H * W), x_nchw.dtype))
    return jnp.concatenate(cols, axis=1)


# ----------------------------- forward ------------------------------------------------------

def seg_cos_decoder_forward(x_nchw, params, size_, *, matmul_dtype=jnp.bfloat16,
                            pixel_block=512):
    B, Cin, H, W = x_nchw.shape
    Hout, Wout = size_
    hidden = params["w_conv_mat"].shape[-1]                       # 256
    num_classes = params["w_cls"].shape[-1]
    HW = H * W
    K1 = 9 * Cin + 1                                              # +1 = folded BN bias row

    pixel_block = min(pixel_block, HW)
    assert HW % pixel_block == 0, "H*W must be divisible by pixel_block"
    n_pix_blocks = HW // pixel_block

    # ---- operand prep (folding + channel-major layouts), cheap one-time glue ---------------
    patches_t = _im2col_3x3_cm(x_nchw).astype(matmul_dtype)       # (B, K1, HW)
    wconv_aug = jnp.concatenate(
        [(params["w_conv_mat"] * params["bn_scale"]).T,           # BN scale folded
         params["bn_bias"].reshape(hidden, 1)],                   # BN bias as extra column
        axis=1).astype(matmul_dtype)                              # (hidden, K1)
    wcls_t = (10.0 * params["w_cls"]).T.astype(matmul_dtype)      # (nc, hidden), 10x folded

    # fused bilinear resize matrix (align_corners=False): kron(Rh, Rw)^T, pixels lane-dense.
    Rh = _linear_resize_matrix(Hout, H)
    Rw = _linear_resize_matrix(Wout, W)
    RT = jnp.asarray(np.kron(Rh, Rw).T)                           # (H*W, Hout*Wout), f32

    kernel = functools.partial(_fused_head_resize_kernel, n_pix_blocks=n_pix_blocks)

    out = pl.pallas_call(
        kernel,
        out_shape=jax.ShapeDtypeStruct((B, num_classes, Hout * Wout), jnp.float32),
        grid_spec=pltpu.PrefetchScalarGridSpec(
            num_scalar_prefetch=0,
            grid=(B, n_pix_blocks),
            in_specs=[
                pl.BlockSpec((1, K1, pixel_block), lambda b, j: (b, 0, j)),
                pl.BlockSpec((hidden, K1), lambda b, j: (0, 0)),
                pl.BlockSpec((num_classes, hidden), lambda b, j: (0, 0)),
                pl.BlockSpec((HW, Hout * Wout), lambda b, j: (0, 0)),
            ],
            out_specs=pl.BlockSpec((1, num_classes, Hout * Wout), lambda b, j: (b, 0, 0)),
            scratch_shapes=[pltpu.VMEM((num_classes, HW), jnp.float32)],
        ),
        compiler_params=pltpu.CompilerParams(
            dimension_semantics=("parallel", "arbitrary")),
    )(patches_t, wconv_aug, wcls_t, RT)

    return out.reshape(B, num_classes, Hout, Wout)                # metadata-only reshape (NCHW)


# ----------------------------- pure-JAX reference -------------------------------------------

def _reference(x_nchw, w_conv_hwio, bn_scale, bn_bias, w_cls, size_):
    B, Cin, H, W = x_nchw.shape
    Hout, Wout = size_
    x = jnp.transpose(x_nchw, (0, 2, 3, 1))
    y = jax.lax.conv_general_dilated(
        x, w_conv_hwio, (1, 1), "SAME",
        dimension_numbers=("NHWC", "HWIO", "NHWC"))
    y = y * bn_scale + bn_bias
    y = jnp.maximum(y, 0.0)
    norm = jnp.sqrt(jnp.sum(y * y, axis=-1, keepdims=True))
    yn = y / (norm + 1e-10)
    logits = 10.0 * jnp.einsum("bhwc,ck->bhwk", yn, w_cls)
    Rh = jnp.asarray(_linear_resize_matrix(Hout, H))
    Rw = jnp.asarray(_linear_resize_matrix(Wout, W))
    out = jnp.einsum("ph,bhwk->bpwk", Rh, logits)
    out = jnp.einsum("qw,bpwk->bpqk", Rw, out)
    return jnp.transpose(out, (0, 3, 1, 2))


# ----------------------------- main ----------------------------------------------------------

if __name__ == "__main__":
    B, Cin, H, W = 2, 4, 16, 16
    hidden = 256                      # fixed by the module (Conv2d(in, 256, 3))
    num_classes = 16
    size_ = (32, 32)

    key = jax.random.PRNGKey(0)
    kx, k1, k2, k3, k4, k5, k6 = jax.random.split(key, 7)

    x = jax.random.normal(kx, (B, Cin, H, W), jnp.float32)

    # deterministic synthetic parameters
    w_conv_hwio = jax.random.normal(k1, (3, 3, Cin, hidden), jnp.float32) * 0.1
    gamma = 1.0 + 0.1 * jax.random.normal(k2, (hidden,), jnp.float32)
    beta = 0.1 * jax.random.normal(k3, (hidden,), jnp.float32)
    running_mean = 0.1 * jax.random.normal(k4, (hidden,), jnp.float32)
    running_var = jax.random.uniform(k5, (hidden,), jnp.float32, 0.5, 1.5)
    w_cls_raw = jax.random.normal(k6, (num_classes, hidden), jnp.float32) * 0.1

    eps = 1e-5
    inv_std = gamma / jnp.sqrt(running_var + eps)
    bn_scale = inv_std.reshape(1, hidden)
    bn_bias = (beta - running_mean * inv_std).reshape(1, hidden)
    # cosine classifier weight: L2-normalize each class row (matches torch.norm(dim=1))
    w_cls_n = w_cls_raw / (jnp.linalg.norm(w_cls_raw, axis=1, keepdims=True) + 1e-10)
    w_cls = w_cls_n.T                                   # (hidden, num_classes)
    w_conv_mat = w_conv_hwio.reshape(9 * Cin, hidden)   # row = (dh*3+dw)*Cin + ci

    params = dict(w_conv_mat=w_conv_mat, bn_scale=bn_scale, bn_bias=bn_bias, w_cls=w_cls)

    ref = _reference(x, w_conv_hwio, bn_scale, bn_bias, w_cls, size_)

    # f32 matmul-operand path: tight correctness check
    out_f32 = seg_cos_decoder_forward(x, params, size_, matmul_dtype=jnp.float32)
    out_f32 = jax.block_until_ready(out_f32)
    np.testing.assert_allclose(np.asarray(out_f32), np.asarray(ref), rtol=1e-4, atol=1e-4)
    assert out_f32.shape == (B, num_classes, size_[0], size_[1])

    # default bf16 matmul-operand path (f32 accumulation / f32 elementwise): loose sanity check
    out_bf16 = seg_cos_decoder_forward(x, params, size_)
    out_bf16 = jax.block_until_ready(out_bf16)
    np.testing.assert_allclose(np.asarray(out_bf16), np.asarray(ref), rtol=0.1, atol=0.1)
    assert out_bf16.shape == (B, num_classes, size_[0], size_[1])

    print("KERNEL_OK")
</pallas_src>

<mosaic_0001>
module attributes {stable_mosaic.version = 11 : i64} {
  func.func @_fused_head_resize_kernel(%arg0: i32, %arg1: i32, %arg2: memref<1x37x256xf32, #tpu.memory_space<vmem>>, %arg3: memref<256x37xf32, #tpu.memory_space<vmem>>, %arg4: memref<16x256xf32, #tpu.memory_space<vmem>>, %arg5: memref<256x1024xf32, #tpu.memory_space<vmem>>, %arg6: memref<1x16x1024xf32, #tpu.memory_space<vmem>>, %arg7: memref<16x256xf32, #tpu.memory_space<vmem>>) attributes {dimension_semantics = [#tpu.dimension_semantics<parallel>, #tpu.dimension_semantics<arbitrary>], iteration_bounds = array<i64: 2, 1>, scalar_prefetch = 0 : i64, scratch_operands = 1 : i64, tpu.core_type = #tpu.core_type<tc>, window_params = [{transform_indices = @transform_0, window_bounds = array<i64: 1, 37, 256>}, {pipeline_mode = #tpu.pipeline_mode<synchronous>, transform_indices = @transform_1, window_bounds = array<i64: 256, 37>}, {pipeline_mode = #tpu.pipeline_mode<synchronous>, transform_indices = @transform_2, window_bounds = array<i64: 16, 256>}, {pipeline_mode = #tpu.pipeline_mode<synchronous>, transform_indices = @transform_3, window_bounds = array<i64: 256, 1024>}, {transform_indices = @transform_4, window_bounds = array<i64: 1, 16, 1024>}]} {
    %c0 = arith.constant 0 : index
    %c0_0 = arith.constant 0 : index
    %0 = vector.load %arg3[%c0, %c0_0] : memref<256x37xf32, #tpu.memory_space<vmem>>, vector<256x37xf32>
    %c0_1 = arith.constant 0 : index
    %c0_2 = arith.constant 0 : index
    %c0_3 = arith.constant 0 : index
    %1 = vector.load %arg2[%c0_1, %c0_2, %c0_3] : memref<1x37x256xf32, #tpu.memory_space<vmem>>, vector<1x37x256xf32>
    %2 = vector.shape_cast %1 : vector<1x37x256xf32> to vector<37x256xf32>
    %cst = arith.constant dense<0.000000e+00> : vector<256x256xf32>
    %3 = tpu.matmul %0, %2, %cst {dimension_numbers = #tpu.dot_dimension_numbers<[1], [0], [0], [1], [0, 0, 1, 1], [], []>} : vector<256x37xf32>, vector<37x256xf32>, vector<256x256xf32> -> vector<256x256xf32>
    %cst_4 = arith.constant 0.000000e+00 : f32
    %4 = vector.broadcast %cst_4 : f32 to vector<256x256xf32>
    %5 = arith.maximumf %3, %4 : vector<256x256xf32>
    %6 = arith.mulf %5, %5 : vector<256x256xf32>
    %cst_5 = arith.constant dense<0.000000e+00> : vector<256xf32>
    %7 = vector.multi_reduction <add>, %6, %cst_5 [0] : vector<256x256xf32> to vector<256xf32>
    %8 = vector.shape_cast %7 : vector<256xf32> to vector<1x256xf32>
    %cst_6 = arith.constant 9.99999968E-21 : f32
    %9 = vector.broadcast %cst_6 : f32 to vector<1x256xf32>
    %10 = arith.addf %8, %9 : vector<1x256xf32>
    %11 = math.rsqrt %10 : vector<1x256xf32>
    %c0_7 = arith.constant 0 : index
    %c0_8 = arith.constant 0 : index
    %12 = vector.load %arg4[%c0_7, %c0_8] : memref<16x256xf32, #tpu.memory_space<vmem>>, vector<16x256xf32>
    %cst_9 = arith.constant dense<0.000000e+00> : vector<16x256xf32>
    %13 = tpu.matmul %12, %5, %cst_9 {dimension_numbers = #tpu.dot_dimension_numbers<[1], [0], [0], [1], [0, 0, 1, 1], [], []>} : vector<16x256xf32>, vector<256x256xf32>, vector<16x256xf32> -> vector<16x256xf32>
    %14 = vector.broadcast %11 : vector<1x256xf32> to vector<16x256xf32>
    %15 = arith.mulf %13, %14 : vector<16x256xf32>
    %c0_10 = arith.constant 0 : index
    %c0_11 = arith.constant 0 : index
    %16 = vector.load %arg5[%c0_10, %c0_11] : memref<256x1024xf32, #tpu.memory_space<vmem>>, vector<256x1024xf32>
    %cst_12 = arith.constant dense<0.000000e+00> : vector<16x1024xf32>
    %17 = tpu.matmul %15, %16, %cst_12 {dimension_numbers = #tpu.dot_dimension_numbers<[1], [0], [0], [1], [0, 0, 1, 1], [], []>} : vector<16x256xf32>, vector<256x1024xf32>, vector<16x1024xf32> -> vector<16x1024xf32>
    %c0_13 = arith.constant 0 : index
    %c0_14 = arith.constant 0 : index
    %c0_15 = arith.constant 0 : index
    %18 = vector.load %arg6[%c0_13, %c0_14, %c0_15] : memref<1x16x1024xf32, #tpu.memory_space<vmem>>, vector<1x16x1024xf32>
    %19 = vector.shape_cast %18 : vector<1x16x1024xf32> to vector<16x1024xf32>
    %20 = vector.shape_cast %17 : vector<16x1024xf32> to vector<1x16x1024xf32>
    tpu.vector_store %arg6[%c0_13, %c0_14, %c0_15], %20 {strides = array<i32>} : memref<1x16x1024xf32, #tpu.memory_space<vmem>>, vector<1x16x1024xf32>,
    return
  }
  func.func @transform_0(%arg0: i32, %arg1: i32) -> (i32, i32, i32) {
    %c0_i32 = arith.constant 0 : i32
    %c0_i32_0 = arith.constant 0 : i32
    return %arg0, %c0_i32, %arg1 : i32, i32, i32
  }
  func.func @transform_1(%arg0: i32, %arg1: i32) -> (i32, i32) {
    %c0_i32 = arith.constant 0 : i32
    %c0_i32_0 = arith.constant 0 : i32
    %c0_i32_1 = arith.constant 0 : i32
    return %c0_i32, %c0_i32_0 : i32, i32
  }
  func.func @transform_2(%arg0: i32, %arg1: i32) -> (i32, i32) {
    %c0_i32 = arith.constant 0 : i32
    %c0_i32_0 = arith.constant 0 : i32
    %c0_i32_1 = arith.constant 0 : i32
    return %c0_i32, %c0_i32_0 : i32, i32
  }
  func.func @transform_3(%arg0: i32, %arg1: i32) -> (i32, i32) {
    %c0_i32 = arith.constant 0 : i32
    %c0_i32_0 = arith.constant 0 : i32
    %c0_i32_1 = arith.constant 0 : i32
    return %c0_i32, %c0_i32_0 : i32, i32
  }
  func.func @transform_4(%arg0: i32, %arg1: i32) -> (i32, i32, i32) {
    %c0_i32 = arith.constant 0 : i32
    %c0_i32_0 = arith.constant 0 : i32
    %c0_i32_1 = arith.constant 0 : i32
    return %arg0, %c0_i32, %c0_i32_0 : i32, i32, i32
  }
}

</mosaic_0001>

<bundles_post_ra>
// kernel: tpu_custom_call.1
= control target key start
LH: loop header
LB: loop body
LE: loop exit
PB: predicated region body
PF: predicated region fallthrough
CT: control target
= control target key end

     0   :  { %9 = vsyncpa [#allocation4], 0  ;;  %s2586_s0 = inlined_call_operand.vmem [shape: f32[2,37,256], index: 0, kind: input, shape index: {}]   ;;  %s2587_s1 = inlined_call_operand.vmem [shape: f32[256,37], index: 1, kind: input, shape index: {}]   ;;  %s2588_s2 = inlined_call_operand.vmem [shape: f32[16,256], index: 2, kind: input, shape index: {}]   ;;  %s2589_s3 = inlined_call_operand.hbm [shape: f32[256,1024], index: 3, kind: input, shape index: {}]   ;;  %s2590_s4 = inlined_call_operand.hbm [shape: f32[2,16,1024], index: 4, kind: output, shape index: {}]  }
   0x1   :  { %10 = vsyncpa [#allocation5], 0 }
   0x2   :  { %12 = vsyncpa [#allocation5 + $0x1], 0  ;;  %s2212_s15 = smov 0   ;;  %s2214_s16 = smov 0  }
   0x3   :  { %s2216_s17 = smov 0   ;;  %s2218_s18 = smov 0  }
   0x4   :  { %s2220_s19 = smov 0   ;;  %s2222_s20 = smov 0  }
   0x5 LB: > { %s1615_s21 = sadd.s32 4294967295, %s2178_s20   ;;  %s1616_s22 = sadd.s32 4294967294, %s2178_s20   ;;  %s2178_s20 = sphi %s2222_s20, %s18_s20   ;;  %s2174_s19 = sphi %s2220_s19, %s2608_s19   ;;  %s2170_s18 = sphi %s2218_s18, %s2607_s18   ;;  %s2166_s17 = sphi %s2216_s17, %s2606_s17   ;;  %s2162_s16 = sphi %s2214_s16, %s2605_s16   ;;  %s2158_s15 = sphi %s2212_s15, %s2604_s15  }
   0x6   : > { %s30_s23 = sadd.s32 1, %s2174_s19  ;;  %s128_s24 = sadd.s32 1, %s2166_s17 }
   0x7   : > { %p32_p0 = scmp.ge.s32.totalorder %s30_s23, 2  ;;  %p138_p1 = scmp.ne.s32.totalorder %s2166_s17, %s2162_s16 }
   0x8   : > { %p139_p2 = scmp.eq.s32.totalorder %s1615_s21, 1  ;;  %p144_p3 = scmp.ne.s32.totalorder %s2162_s16, %s2158_s15 }
   0x9   : > { %s2610_s23 = smov (%p32_p0, %s30_s23), 0  ;;  %p145_p5 = scmp.eq.s32.totalorder %s1616_s22, 1 }
   0xa   : > { %p2252_p4 = por %p139_p2, %p138_p1  ;;  %s125_s26 = ssub.s32 %s2174_s19, %s2610_s23 }
   0xb   : > { %p1617_p6 = scmp.ge.s32.totalorder %s2178_s20, 1  ;;  %p126_p7 = scmp.eq.s32.totalorder %s125_s26, 0 }
   0xc   : > { %s2595_s25 = scalar_select %p2252_p4, 1, 0 }
   0xd   : > { %p2259_p8 = por %p145_p5, %p144_p3  ;;  %p152_p9 = scmp.lt.s32.totalorder %s2178_s20, 3 }
   0xe   : > { %s2265_s28 = scalar_select %p126_p7, %s2166_s17, %s128_s24  }
   0xf   : > { %s2596_s27 = scalar_select %p2259_p8, 1, 0 }
  0x10   : > { %p2267_p10 = pnand %p1617_p6, %p152_p9  ;;  %p2271_p11 = scmp.eq.s32.totalorder %s1615_s21, 0 }
  0x11   : > { %s2180_s5 = smov [#allocation3]   ;;  %s2068_s10 = scalar_lea.hbm %s2589_s3, 32768 }
  0x12   : > { %s2597_s29 = scalar_select %p2267_p10, 1, 0 }
  0x13   : > { %s2598_s30 = scalar_select %p2271_p11, 1, 0 }
  0x14   : > { %p1999_p12 = pneg %p2267_p10  ;;  %s170_s6 = sshll.u32 %s2180_s5, 4  ;;  %s171_s6 = int_to_ptr.vmem [resolvable:$true] %s170_s6 }
  0x15   : > { %p2069_p0 = scmp.ne.s32.totalorder %s2589_s3, %s2068_s10  ;;  %p2075_p5 = scmp.lt.u32.totalorder %s2068_s10, %s2589_s3 }
  0x16   : > { %p2279_p13 = pnand %p2271_p11, %p1999_p12 }
  0x18   : > { %p2070_p1 = pneg %p2279_p13 }
  0x1a   : > { %p2071_p2 = pnand %p2070_p1, %p2069_p0 }
  0x1c   : > { %p2072_p3 = pneg %p2071_p2 }
  0x1e   : > { %p2077_p6 = pnand %p2075_p5, %p2072_p3 }
  0x20   : > { %2080 = shalt.err (!%p2077_p6)
}
  0x21   : > { %s2081_s21 = scalar_lea.vmem %s171_s6, 32768  ;;  %p2089_p8 = scmp.lt.s32.totalorder %s171_s6, %s171_s6 }
  0x22   : > { %p2082_p7 = scmp.ne.s32.totalorder %s171_s6, %s2081_s21  ;;  %p2090_p4 = scmp.lt.s32.totalorder %s2081_s21, %s2081_s21 }
  0x24   : > { %p2084_p9 = pnand %p2082_p7, %p2070_p1  ;;  %p2091_p11 = por %p2090_p4, %p2089_p8 }
  0x26   : > { %p2085_p12 = pneg %p2084_p9 }
  0x28   : > { %p2092_p10 = pnand %p2091_p11, %p2085_p12 }
  0x2a   : > { %2095 = shalt.err (!%p2092_p10)
}
  0x2b   : > { %s2181_s22 = smov 1024   ;;  %s2182_s24 = smov 64  }
  0x2c   : > { %2002 = dma.hbm_to_vmem [thread:$0]  (!%p2279_p13), %s2589_s3, 32768, %s171_s6, [#allocation4], %s2181_s22, %s2181_s22, %s2182_s24  }
  0x2d   : > { %p2600_p0 = scmp.ne.s32.totalorder %s2597_s29, 0 }
  0x2e   : > { %p2601_p2 = scmp.ne.s32.totalorder (!%p2600_p0), %s2598_s30, 0 }
  0x2f   : > { %199 = sbr.rel (%p2600_p0) target bundleno = 932 (0x3a4), region = 36 }
  0x36   : > { %2149 = dma.done.wait (%p2601_p2), [#allocation4], 32768  }
  0x37   : > { %2151 = vsyncadd (%p2601_p2), [#allocation4], 4294934528  ;;  %p230_p4 = scmp.lt.s32.totalorder %s2170_s18, 1  ;;  %v2183_v0 = vmov 0.0   ;;  %vm378_vm0 = vcmask 1044480   ;;  %v239_v15 = vld [vmem:[%s2587_s1] sm:$0xff] }
  0x38   : > { %449 = vmatprep.mubr.f32.mxu0 %v2183_v0  ;;  %vm281_vm1 = vcmask 302080   ;;  %v240_v16 = vld [vmem:[%s2587_s1 + $0x8] sm:$0xff]  ;;  %v241_v17 = vld [vmem:[%s2587_s1 + $0x10] sm:$0xff]  ;;  %v242_v18 = vld [vmem:[%s2587_s1 + $0x18] sm:$0xff]  ;;  %s226_s24 = sand.u32 1, %s2162_s16   ;;  %p2602_p10 = scmp.ne.s32.totalorder %s2595_s25, 0 }
  0x39   : > { %s231_s7 = scalar_select %p230_p4, %s2170_s18, 1  ;;  %v243_v19 = vld [vmem:[%s2587_s1 + $0x20] sm:$0xff]  ;;  %v244_v20 = vld [vmem:[%s2587_s1 + $0x28] sm:$0xff]  ;;  %v245_v21 = vld [vmem:[%s2587_s1 + $0x30] sm:$0xff] }
  0x3a   : > { %v246_v22 = vld [vmem:[%s2587_s1 + $0x38] sm:$0xff]  ;;  %v247_v23 = vld [vmem:[%s2587_s1 + $0x40] sm:$0xff]  ;;  %v248_v24 = vld [vmem:[%s2587_s1 + $0x48] sm:$0xff]  ;;  %s1622_s26 = sshll.u32 %s226_s24, 7  ;;  %s2184_s30 = smov [#allocation6]  }
  0x3b   : > { %s1992_s8 = smul.u32 80, %s231_s7  ;;  %v249_v25 = vld [vmem:[%s2587_s1 + $0x50] sm:$0xff]  ;;  %v250_v26 = vld [vmem:[%s2587_s1 + $0x58] sm:$0xff]  ;;  %v251_v27 = vld [vmem:[%s2587_s1 + $0x60] sm:$0xff]  ;;  %s2511_s5 = scalar_lea.vmem [#allocation6], %s1622_s26 }
  0x3c   : > { %v252_v28 = vld [vmem:[%s2587_s1 + $0x68] sm:$0xff]  ;;  %v253_v29 = vld [vmem:[%s2587_s1 + $0x70] sm:$0xff]  ;;  %v254_v30 = vld [vmem:[%s2587_s1 + $0x78] sm:$0xff]  ;;  %s1663_s7 = sshll.u32 %s2170_s18, 11  ;;  %s2540_s18 = scalar_lea.sflag [#allocation5], %s226_s24 }
  0x3d   : > { %s237_s6 = scalar_lea.vmem %s2586_s0, %s1992_s8  ;;  %v255_v31 = vld [vmem:[%s2587_s1 + $0x80] sm:$0xff]  ;;  %v256_v32 = vld [vmem:[%s2587_s1 + $0x88] sm:$0xff]  ;;  %v257_v33 = vld [vmem:[%s2587_s1 + $0x90] sm:$0xff]  ;;  %s1527_s8 = sshll.u32 %s2511_s5, 4  ;;  %s2532_s8 = int_to_ptr.vmem [resolvable:$true] %s1527_s8 }
  0x3e   : > { %v272_v1 = vld [vmem:[%s237_s6 + $0x8] sm:$0xff]  ;;  %v274_v2 = vld [vmem:[%s237_s6 + $0x18] sm:$0xff]  ;;  %v271_v3 = vld [vmem:[%s237_s6] sm:$0xff]  ;;  %s2096_s29 = scalar_lea.vmem %s2532_s8, 2048  ;;  %s2100_s11 = sshll.u32 %s2184_s30, 4  ;;  %s2101_s11 = int_to_ptr.vmem [resolvable:$false] %s2100_s11 }
  0x3f   : > { %v1664_v4 = vpack.c.bf16 %v274_v2, %v272_v1  ;;  %v273_v5 = vld [vmem:[%s237_s6 + $0x10] sm:$0xff]  ;;  %v276_v6 = vld [vmem:[%s237_s6 + $0x28] sm:$0xff]  ;;  %v278_v7 = vld [vmem:[%s237_s6 + $0x38] sm:$0xff]  ;;  %p2097_p8 = scmp.ne.s32.totalorder %s2532_s8, %s2096_s29  ;;  %s2102_s12 = scalar_lea.vmem %s2101_s11, 4096 }
  0x40   : > { %v1666_v8 = vpack.c.bf16 %v273_v5, %v271_v3  ;;  %v1668_v9 = vpack.c.bf16 %v278_v7, %v276_v6  ;;  %v275_v10 = vld [vmem:[%s237_s6 + $0x20] sm:$0xff]  ;;  %v277_v11 = vld [vmem:[%s237_s6 + $0x30] sm:$0xff]  ;;  %v280_v13 = vld [vmem:[%s237_s6 + $0x48] sm:$0x1f]  ;;  %p2103_p1 = scmp.lt.s32.totalorder %s2532_s8, %s2101_s11  ;;  %p2104_p3 = scmp.lt.s32.totalorder %s2102_s12, %s2096_s29 }
  0x41   : > { %1665 = vmatprep.subr.bf16.mxu0 %v1664_v4  ;;  %v1670_v12 = vpack.c.bf16 %v277_v11, %v275_v10  ;;  %v279_v14 = vld [vmem:[%s237_s6 + $0x40] sm:$0x1f]  ;;  %v258_v34 = vld [vmem:[%s2587_s1 + $0x98] sm:$0xff]  ;;  %v260_v36 = vld [vmem:[%s2587_s1 + $0xa8] sm:$0xff]  ;;  %s2530_s6 = scalar_lea.hbm %s2590_s4, %s1663_s7  ;;  %p2098_p11 = pnand %p2097_p8, %p2602_p10 }
  0x42   : > { %1667 = vmatpush1.bf16.msra.mxu0 %v1666_v8  ;;  %v259_v35 = vld [vmem:[%s2587_s1 + $0xa0] sm:$0xff]  ;;  %v261_v37 = vld [vmem:[%s2587_s1 + $0xb0] sm:$0xff]  ;;  %v262_v38 = vld [vmem:[%s2587_s1 + $0xb8] sm:$0xff]  ;;  %p2105_p5 = por %p2104_p3, %p2103_p1 }
  0x43   : > { %1669 = vmatprep.subr.bf16.mxu0 %v1668_v9  ;;  %v263_v39 = vld [vmem:[%s2587_s1 + $0xc0] sm:$0xff]  ;;  %v264_v40 = vld [vmem:[%s2587_s1 + $0xc8] sm:$0xff]  ;;  %v265_v41 = vld [vmem:[%s2587_s1 + $0xd0] sm:$0xff]  ;;  %p2099_p13 = pneg %p2098_p11 }
  0x44   : > { %v266_v42 = vld [vmem:[%s2587_s1 + $0xd8] sm:$0xff]  ;;  %v267_v43 = vld [vmem:[%s2587_s1 + $0xe0] sm:$0xff]  ;;  %v268_v44 = vld [vmem:[%s2587_s1 + $0xe8] sm:$0xff] }
  0x45   : > { %v269_v45 = vld [vmem:[%s2587_s1 + $0xf0] sm:$0xff]  ;;  %v270_v46 = vld [vmem:[%s2587_s1 + $0xf8] sm:$0xff]  ;;  %v849_v52 = vld [vmem:[%s2588_s2 + $0x8] sm:$0xff]  ;;  %p2106_p6 = pnand %p2105_p5, %p2099_p13 }
  0x46   : > { %1671 = vmatpush1.bf16.msra.mxu0 %v1670_v12  ;;  %916 = vmatprep.mubr.f32.mxu1 %v849_v52 }
  0x47   : > { %1624 = vmatprep.subr.msk.mxu0 %vm378_vm0, %v280_v13 }
  0x4a   : > { %1625 = vmatpush1.msk.msra.mxu0 %vm378_vm0, %v279_v14 }
  0x4b   : > { %1626 = vmatmul.mubr.msk.f32.vlgmr.msra.gmra.mrb[0].mxu0 %vm281_vm1, %v239_v15 }
  0x4c   : > { %455 = vmatprep.mubr.f32.mxu0 %v2183_v0 }
  0x4f   : > { %1627 = vmatmul.mubr.msk.f32.gmra.mrb[2].mxu0 %vm281_vm1, %v240_v16 }
  0x50   : > { %461 = vmatprep.mubr.f32.mxu0 %v2183_v0 }
  0x53   : > { %1628 = vmatmul.mubr.msk.f32.gmra.mrb[4].mxu0 %vm281_vm1, %v241_v17  ;;  %v936_v17 = vld [vmem:[#allocation3 + $0x18] sm:$0xff] }
  0x54   : > { %467 = vmatprep.mubr.f32.mxu0 %v2183_v0 }
  0x57   : > { %1629 = vmatmul.mubr.msk.f32.gmra.mrb[6].mxu0 %vm281_vm1, %v242_v18  ;;  %v944_v18 = vld [vmem:[#allocation3 + $0x58] sm:$0xff] }
  0x58   : > { %473 = vmatprep.mubr.f32.mxu0 %v2183_v0 }
  0x5b   : > { %1630 = vmatmul.mubr.msk.f32.gmra.mrb[8].mxu0 %vm281_vm1, %v243_v19  ;;  %v935_v19 = vld [vmem:[#allocation3 + $0x10] sm:$0xff] }
  0x5c   : > { %479 = vmatprep.mubr.f32.mxu0 %v2183_v0 }
  0x5f   : > { %1631 = vmatmul.mubr.msk.f32.gmra.mrb[10].mxu0 %vm281_vm1, %v244_v20 }
  0x60   : > { %485 = vmatprep.mubr.f32.mxu0 %v2183_v0 }
  0x63   : > { %1632 = vmatmul.mubr.msk.f32.gmra.mrb[12].mxu0 %vm281_vm1, %v245_v21 }
  0x64   : > { %491 = vmatprep.mubr.f32.mxu0 %v2183_v0 }
  0x67   : > { %1633 = vmatmul.mubr.msk.f32.gmra.mrb[14].mxu0 %vm281_vm1, %v246_v22 }
  0x68   : > { %497 = vmatprep.mubr.f32.mxu0 %v2183_v0 }
  0x6b   : > { %1634 = vmatmul.mubr.msk.f32.gmra.mrb[16].mxu0 %vm281_vm1, %v247_v23  ;;  %v1800_v23 = vpack.c.bf16 %v944_v18, %v936_v17 }
  0x6c   : > { %503 = vmatprep.mubr.f32.mxu0 %v2183_v0 }
  0x6d   : > { %1801 = vmatprep.subr.bf16.mxu0 %v1800_v23 }
  0x6f   : > { %1635 = vmatmul.mubr.msk.f32.gmra.mrb[18].mxu0 %vm281_vm1, %v248_v24  ;;  %v943_v24 = vld [vmem:[#allocation3 + $0x50] sm:$0xff] }
  0x70   : > { %509 = vmatprep.mubr.f32.mxu0 %v2183_v0 }
  0x73   : > { %1636 = vmatmul.mubr.msk.f32.gmra.mrb[20].mxu0 %vm281_vm1, %v249_v25  ;;  %v952_v25 = vld [vmem:[#allocation3 + $0x98] sm:$0xff] }
  0x74   : > { %515 = vmatprep.mubr.f32.mxu0 %v2183_v0 }
  0x77   : > { %1637 = vmatmul.mubr.msk.f32.gmra.mrb[22].mxu0 %vm281_vm1, %v250_v26  ;;  %v960_v26 = vld [vmem:[#allocation3 + $0xd8] sm:$0xff] }
  0x78   : > { %521 = vmatprep.mubr.f32.mxu0 %v2183_v0 }
  0x7b   : > { %1638 = vmatmul.mubr.msk.f32.gmra.mrb[24].mxu0 %vm281_vm1, %v251_v27 }
  0x7c   : > { %527 = vmatprep.mubr.f32.mxu0 %v2183_v0 }
  0x7f   : > { %1639 = vmatmul.mubr.msk.f32.gmra.mrb[26].mxu0 %vm281_vm1, %v252_v28 }
  0x80   : > { %533 = vmatprep.mubr.f32.mxu0 %v2183_v0 }
  0x83   : > { %1640 = vmatmul.mubr.msk.f32.gmra.mrb[28].mxu0 %vm281_vm1, %v253_v29  ;;  %v1802_v29 = vpack.c.bf16 %v943_v24, %v935_v19 }
  0x84   : > { %539 = vmatprep.mubr.f32.mxu0 %v2183_v0 }
  0x85   : > { %1803 = vmatpush1.bf16.msra.mxu0 %v1802_v29  ;;  %v1032_v29 = vld [vmem:[#allocation3 + $0x318] sm:$0xff] }
  0x87   : > { %1641 = vmatmul.mubr.msk.f32.gmra.mrb[30].mxu0 %vm281_vm1, %v254_v30  ;;  %v1804_v30 = vpack.c.bf16 %v960_v26, %v952_v25  ;;  %v1015_v25 = vld [vmem:[#allocation3 + $0x290] sm:$0xff] }
  0x88   : > { %545 = vmatprep.mubr.f32.mxu0 %v2183_v0  ;;  %v1023_v26 = vld [vmem:[#allocation3 + $0x2d0] sm:$0xff] }
  0x89   : > { %1805 = vmatprep.subr.bf16.mxu0 %v1804_v30  ;;  %v1040_v30 = vld [vmem:[#allocation3 + $0x358] sm:$0xff] }
  0x8b   : > { %1642 = vmatmul.mubr.msk.f32.gmra.mrb[32].mxu0 %vm281_vm1, %v255_v31  ;;  %v951_v31 = vld [vmem:[#allocation3 + $0x90] sm:$0xff] }
  0x8c   : > { %551 = vmatprep.mubr.f32.mxu0 %v2183_v0 }
  0x8f   : > { %1643 = vmatmul.mubr.msk.f32.gmra.mrb[34].mxu0 %vm281_vm1, %v256_v32  ;;  %v959_v32 = vld [vmem:[#allocation3 + $0xd0] sm:$0xff] }
  0x90   : > { %557 = vmatprep.mubr.f32.mxu0 %v2183_v0 }
  0x93   : > { %1644 = vmatmul.mubr.msk.f32.gmra.mrb[36].mxu0 %vm281_vm1, %v257_v33  ;;  %v968_v33 = vld [vmem:[#allocation3 + $0x118] sm:$0xff] }
  0x94   : > { %563 = vmatprep.mubr.f32.mxu0 %v2183_v0 }
  0x97   : > { %1645 = vmatmul.mubr.msk.f32.gmra.mrb[38].mxu0 %vm281_vm1, %v258_v34 }
  0x98   : > { %569 = vmatprep.mubr.f32.mxu0 %v2183_v0 }
  0x9b   : > { %1646 = vmatmul.mubr.msk.f32.gmra.mrb[40].mxu0 %vm281_vm1, %v259_v35  ;;  %v976_v35 = vld [vmem:[#allocation3 + $0x158] sm:$0xff] }
  0x9c   : > { %575 = vmatprep.mubr.f32.mxu0 %v2183_v0 }
  0x9f   : > { %1647 = vmatmul.mubr.msk.f32.gmra.mrb[42].mxu0 %vm281_vm1, %v260_v36 }
  0xa0   : > { %581 = vmatprep.mubr.f32.mxu0 %v2183_v0 }
  0xa3   : > { %1648 = vmatmul.mubr.msk.f32.gmra.mrb[44].mxu0 %vm281_vm1, %v261_v37 }
  0xa4   : > { %587 = vmatprep.mubr.f32.mxu0 %v2183_v0 }
  0xa7   : > { %1649 = vmatmul.mubr.msk.f32.gmra.mrb[46].mxu0 %vm281_vm1, %v262_v38  ;;  %v1806_v38 = vpack.c.bf16 %v959_v32, %v951_v31 }
  0xa8   : > { %593 = vmatprep.mubr.f32.mxu0 %v2183_v0 }
  0xa9   : > { %1807 = vmatpush1.bf16.msra.mxu0 %v1806_v38  ;;  %v1824_v38 = vpack.c.bf16 %v1040_v30, %v1032_v29 }
  0xab   : > { %1650 = vmatmul.mubr.msk.f32.gmra.mrb[48].mxu0 %vm281_vm1, %v263_v39 }
  0xac   : > { %599 = vmatprep.mubr.f32.mxu0 %v2183_v0 }
  0xaf   : > { %1651 = vmatmul.mubr.msk.f32.gmra.mrb[50].mxu0 %vm281_vm1, %v264_v40 }
  0xb0   : > { %605 = vmatprep.mubr.f32.mxu0 %v2183_v0 }
  0xb3   : > { %1652 = vmatmul.mubr.msk.f32.gmra.mrb[52].mxu0 %vm281_vm1, %v265_v41 }
  0xb4   : > { %611 = vmatprep.mubr.f32.mxu0 %v2183_v0 }
  0xb7   : > { %1653 = vmatmul.mubr.msk.f32.gmra.mrb[54].mxu0 %vm281_vm1, %v266_v42  ;;  %v1808_v42 = vpack.c.bf16 %v976_v35, %v968_v33 }
  0xb8   : > { %617 = vmatprep.mubr.f32.mxu0 %v2183_v0 }
  0xb9   : > { %1809 = vmatprep.subr.bf16.mxu0 %v1808_v42 }
  0xbb   : > { %1654 = vmatmul.mubr.msk.f32.gmra.mrb[56].mxu0 %vm281_vm1, %v267_v43  ;;  %v967_v43 = vld [vmem:[#allocation3 + $0x110] sm:$0xff] }
  0xbc   : > { %623 = vmatprep.mubr.f32.mxu0 %v2183_v0 }
  0xbf   : > { %1655 = vmatmul.mubr.msk.f32.gmra.mrb[58].mxu0 %vm281_vm1, %v268_v44  ;;  %v975_v44 = vld [vmem:[#allocation3 + $0x150] sm:$0xff] }
  0xc0   : > { %629 = vmatprep.mubr.f32.mxu0 %v2183_v0 }
  0xc3   : > { %1656 = vmatmul.mubr.msk.f32.gmra.mrb[60].mxu0 %vm281_vm1, %v269_v45 }
  0xc4   : > { %635 = vmatprep.mubr.f32.mxu0 %v2183_v0 }
  0xc7   : > { %1657 = vmatmul.mubr.msk.f32.gmra.mrb[62].mxu0 %vm281_vm1, %v270_v46 }
 0x11e   : > { %v451_v47 = vpop.f32.mrb[0].mxu0 }
 0x11f   : > { %v453_v48 = vpop.f32.mrb[1].mxu0  ;;  %v642_v49 = vmax.f32 %v451_v47, 0.0  ;;  %v984_v47 = vld [vmem:[#allocation3 + $0x198] sm:$0xff] }
 0x120   : > { %v643_v50 = vmax.f32 %v453_v48, 0.0  ;;  %v992_v48 = vld [vmem:[#allocation3 + $0x1d8] sm:$0xff] }
 0x121   : > { %v706_v56 = vmul.f32 %v642_v49, %v642_v49 }
 0x122   : > { %v457_v51 = vpop.f32.mrb[2].mxu0  ;;  %v707_v59 = vmul.f32 %v643_v50, %v643_v50 }
 0x123   : > { %v644_v53 = vmax.f32 %v457_v51, 0.0  ;;  %v459_v54 = vpop.f32.mrb[3].mxu0 }
 0x124   : > { %v645_v55 = vmax.f32 %v459_v54, 0.0  ;;  %v1810_v54 = vpack.c.bf16 %v975_v44, %v967_v43  ;;  %v1048_v43 = vld [vmem:[#allocation3 + $0x398] sm:$0xff] }
 0x125   : > { %v708_v57 = vmul.f32 %v644_v53, %v644_v53  ;;  %v1674_v58 = vpack.c.bf16 %v644_v53, %v642_v49  ;;  %v1056_v44 = vld [vmem:[#allocation3 + $0x3d8] sm:$0xff] }
 0x126   : > { %v709_v60 = vmul.f32 %v645_v55, %v645_v55  ;;  %v463_v61 = vpop.f32.mrb[4].mxu0  ;;  %v1672_v62 = vpack.c.bf16 %v645_v55, %v643_v50  ;;  %1811 = vmatpush1.bf16.msra.mxu0 %v1810_v54  ;;  %v1828_v54 = vpack.c.bf16 %v1056_v44, %v1048_v43 }
 0x127   : > { %v770_v63 = vadd.f32 %v708_v57, %v706_v56  ;;  %v646_v0 = vmax.f32 %v463_v61, 0.0  ;;  %v465_v1 = vpop.f32.mrb[5].mxu0 }
 0x128   : > { %v807_v2 = vadd.f32 %v709_v60, %v707_v59  ;;  %v647_v3 = vmax.f32 %v465_v1, 0.0  ;;  %1673 = vmatprep.subr.bf16.mxu1 %v1672_v62  ;;  %v983_v59 = vld [vmem:[#allocation3 + $0x190] sm:$0xff] }
 0x129   : > { %v710_v4 = vmul.f32 %v646_v0, %v646_v0  ;;  %1675 = vmatpush1.bf16.msra.mxu1 %v1674_v58  ;;  %v1812_v58 = vpack.c.bf16 %v992_v48, %v984_v47  ;;  %v991_v60 = vld [vmem:[#allocation3 + $0x1d0] sm:$0xff] }
 0x12a   : > { %v711_v5 = vmul.f32 %v647_v3, %v647_v3  ;;  %v469_v6 = vpop.f32.mrb[6].mxu0 }
 0x12b   : > { %v771_v7 = vadd.f32 %v770_v63, %v710_v4  ;;  %v648_v8 = vmax.f32 %v469_v6, 0.0  ;;  %v471_v9 = vpop.f32.mrb[7].mxu0  ;;  %v1000_v63 = vld [vmem:[#allocation3 + $0x218] sm:$0xff]  ;;  %v1814_v4 = vpack.c.bf16 %v991_v60, %v983_v59  ;;  %1813 = vmatprep.subr.bf16.mxu0 %v1812_v58 }
 0x12c   : > { %v808_v10 = vadd.f32 %v807_v2, %v711_v5  ;;  %v649_v11 = vmax.f32 %v471_v9, 0.0  ;;  %v999_v9 = vld [vmem:[#allocation3 + $0x210] sm:$0xff]  ;;  %v1064_v59 = vld [vmem:[#allocation3 + $0x418] sm:$0xff] }
 0x12d   : > { %v712_v12 = vmul.f32 %v648_v8, %v648_v8  ;;  %v1678_v13 = vpack.c.bf16 %v648_v8, %v646_v0  ;;  %v1008_v0 = vld [vmem:[#allocation3 + $0x258] sm:$0xff]  ;;  %1815 = vmatpush1.bf16.msra.mxu0 %v1814_v4 }
 0x12e   : > { %v713_v14 = vmul.f32 %v649_v11, %v649_v11  ;;  %v1676_v15 = vpack.c.bf16 %v649_v11, %v647_v3  ;;  %v475_v16 = vpop.f32.mrb[8].mxu0  ;;  %v1816_v8 = vpack.c.bf16 %v1008_v0, %v1000_v63  ;;  %v1072_v60 = vld [vmem:[#allocation3 + $0x458] sm:$0xff] }
 0x12f   : > { %v772_v20 = vadd.f32 %v771_v7, %v712_v12  ;;  %v650_v21 = vmax.f32 %v475_v16, 0.0  ;;  %v477_v22 = vpop.f32.mrb[9].mxu0  ;;  %v1832_v4 = vpack.c.bf16 %v1072_v60, %v1064_v59 }
 0x130   : > { %v809_v27 = vadd.f32 %v808_v10, %v713_v14  ;;  %v651_v28 = vmax.f32 %v477_v22, 0.0  ;;  %1677 = vmatprep.subr.bf16.mxu1 %v1676_v15  ;;  %v1007_v10 = vld [vmem:[#allocation3 + $0x250] sm:$0xff]  ;;  %v1024_v14 = vld [vmem:[#allocation3 + $0x2d8] sm:$0xff]  ;;  %1817 = vmatprep.subr.bf16.mxu0 %v1816_v8 }
 0x131   : > { %v714_v34 = vmul.f32 %v650_v21, %v650_v21  ;;  %1679 = vmatpush1.bf16.msra.mxu1 %v1678_v13  ;;  %v1016_v13 = vld [vmem:[#allocation3 + $0x298] sm:$0xff] }
 0x132   : > { %v715_v36 = vmul.f32 %v651_v28, %v651_v28  ;;  %v481_v37 = vpop.f32.mrb[10].mxu0  ;;  %v1820_v24 = vpack.c.bf16 %v1024_v14, %v1016_v13 }
 0x133   : > { %v773_v39 = vadd.f32 %v772_v20, %v714_v34  ;;  %v652_v40 = vmax.f32 %v481_v37, 0.0  ;;  %v483_v41 = vpop.f32.mrb[11].mxu0  ;;  %v1818_v20 = vpack.c.bf16 %v1007_v10, %v999_v9  ;;  %v1822_v34 = vpack.c.bf16 %v1023_v26, %v1015_v25  ;;  %v1080_v9 = vld [vmem:[#allocation3 + $0x498] sm:$0xff] }
 0x134   : > { %v810_v45 = vadd.f32 %v809_v27, %v715_v36  ;;  %v653_v46 = vmax.f32 %v483_v41, 0.0  ;;  %v1088_v10 = vld [vmem:[#allocation3 + $0x4d8] sm:$0xff] }
 0x135   : > { %v716_v49 = vmul.f32 %v652_v40, %v652_v40  ;;  %v1682_v50 = vpack.c.bf16 %v652_v40, %v650_v21  ;;  %1819 = vmatpush1.bf16.msra.mxu0 %v1818_v20  ;;  %v1039_v40 = vld [vmem:[#allocation3 + $0x350] sm:$0xff]  ;;  %v1836_v20 = vpack.c.bf16 %v1088_v10, %v1080_v9  ;;  %v1096_v25 = vld [vmem:[#allocation3 + $0x518] sm:$0xff] }
 0x136   : > { %v717_v51 = vmul.f32 %v653_v46, %v653_v46  ;;  %v1680_v52 = vpack.c.bf16 %v653_v46, %v651_v28  ;;  %v487_v53 = vpop.f32.mrb[12].mxu0  ;;  %1821 = vmatprep.subr.bf16.mxu0 %v1820_v24  ;;  %v1104_v26 = vld [vmem:[#allocation3 + $0x558] sm:$0xff] }
 0x137   : > { %v774_v55 = vadd.f32 %v773_v39, %v716_v49  ;;  %v654_v56 = vmax.f32 %v487_v53, 0.0  ;;  %v489_v57 = vpop.f32.mrb[13].mxu0  ;;  %v1031_v39 = vld [vmem:[#allocation3 + $0x310] sm:$0xff] }
 0x138   : > { %v811_v61 = vadd.f32 %v810_v45, %v717_v51  ;;  %v655_v62 = vmax.f32 %v489_v57, 0.0  ;;  %1681 = vmatprep.subr.bf16.mxu1 %v1680_v52 }
 0x139   : > { %v718_v1 = vmul.f32 %v654_v56, %v654_v56  ;;  %1683 = vmatpush1.bf16.msra.mxu1 %v1682_v50  ;;  %1823 = vmatpush1.bf16.msra.mxu0 %v1822_v34  ;;  %v1826_v50 = vpack.c.bf16 %v1039_v40, %v1031_v39  ;;  %v1840_v34 = vpack.c.bf16 %v1104_v26, %v1096_v25  ;;  %v1112_v39 = vld [vmem:[#allocation3 + $0x598] sm:$0xff] }
 0x13a   : > { %v719_v2 = vmul.f32 %v655_v62, %v655_v62  ;;  %v493_v3 = vpop.f32.mrb[14].mxu0  ;;  %1825 = vmatprep.subr.bf16.mxu0 %v1824_v38  ;;  %v1120_v40 = vld [vmem:[#allocation3 + $0x5d8] sm:$0xff] }
 0x13b   : > { %v775_v5 = vadd.f32 %v774_v55, %v718_v1  ;;  %v656_v6 = vmax.f32 %v493_v3, 0.0  ;;  %v495_v7 = vpop.f32.mrb[15].mxu0  ;;  %v1047_v55 = vld [vmem:[#allocation3 + $0x390] sm:$0xff] }
 0x13c   : > { %v812_v11 = vadd.f32 %v811_v61, %v719_v2  ;;  %v657_v12 = vmax.f32 %v495_v7, 0.0 }
 0x13d   : > { %v720_v15 = vmul.f32 %v656_v6, %v656_v6  ;;  %v1686_v16 = vpack.c.bf16 %v656_v6, %v654_v56  ;;  %v1055_v56 = vld [vmem:[#allocation3 + $0x3d0] sm:$0xff]  ;;  %1827 = vmatpush1.bf16.msra.mxu0 %v1826_v50  ;;  %v1844_v50 = vpack.c.bf16 %v1120_v40, %v1112_v39 }
 0x13e   : > { %v721_v17 = vmul.f32 %v657_v12, %v657_v12  ;;  %v1684_v18 = vpack.c.bf16 %v657_v12, %v655_v62  ;;  %v499_v19 = vpop.f32.mrb[16].mxu0  ;;  %v1830_v0 = vpack.c.bf16 %v1055_v56, %v1047_v55  ;;  %1829 = vmatprep.subr.bf16.mxu0 %v1828_v54  ;;  %v1071_v6 = vld [vmem:[#allocation3 + $0x450] sm:$0xff]  ;;  %v1128_v55 = vld [vmem:[#allocation3 + $0x618] sm:$0xff] }
 0x13f   : > { %v776_v21 = vadd.f32 %v775_v5, %v720_v15  ;;  %v658_v22 = vmax.f32 %v499_v19, 0.0  ;;  %v501_v23 = vpop.f32.mrb[17].mxu0  ;;  %v1063_v5 = vld [vmem:[#allocation3 + $0x410] sm:$0xff]  ;;  %v1136_v56 = vld [vmem:[#allocation3 + $0x658] sm:$0xff] }
 0x140   : > { %v813_v27 = vadd.f32 %v812_v11, %v721_v17  ;;  %v659_v28 = vmax.f32 %v501_v23, 0.0  ;;  %1685 = vmatprep.subr.bf16.mxu1 %v1684_v18 }
 0x141   : > { %v722_v31 = vmul.f32 %v658_v22, %v658_v22  ;;  %1687 = vmatpush1.bf16.msra.mxu1 %v1686_v16  ;;  %1831 = vmatpush1.bf16.msra.mxu0 %v1830_v0  ;;  %v1834_v16 = vpack.c.bf16 %v1071_v6, %v1063_v5  ;;  %v1848_v0 = vpack.c.bf16 %v1136_v56, %v1128_v55  ;;  %v1144_v5 = vld [vmem:[#allocation3 + $0x698] sm:$0xff] }
 0x142   : > { %v723_v32 = vmul.f32 %v659_v28, %v659_v28  ;;  %v505_v33 = vpop.f32.mrb[18].mxu0  ;;  %1833 = vmatprep.subr.bf16.mxu0 %v1832_v4  ;;  %v1152_v6 = vld [vmem:[#allocation3 + $0x6d8] sm:$0xff] }
 0x143   : > { %v777_v35 = vadd.f32 %v776_v21, %v722_v31  ;;  %v660_v36 = vmax.f32 %v505_v33, 0.0  ;;  %v507_v37 = vpop.f32.mrb[19].mxu0  ;;  %v1079_v21 = vld [vmem:[#allocation3 + $0x490] sm:$0xff] }
 0x144   : > { %v814_v41 = vadd.f32 %v813_v27, %v723_v32  ;;  %v661_v42 = vmax.f32 %v507_v37, 0.0 }
 0x145   : > { %v724_v45 = vmul.f32 %v660_v36, %v660_v36  ;;  %v1690_v46 = vpack.c.bf16 %v660_v36, %v658_v22  ;;  %v1087_v22 = vld [vmem:[#allocation3 + $0x4d0] sm:$0xff]  ;;  %1835 = vmatpush1.bf16.msra.mxu0 %v1834_v16  ;;  %v1852_v16 = vpack.c.bf16 %v1152_v6, %v1144_v5 }
 0x146   : > { %v725_v47 = vmul.f32 %v661_v42, %v661_v42  ;;  %v1688_v48 = vpack.c.bf16 %v661_v42, %v659_v28  ;;  %v511_v49 = vpop.f32.mrb[20].mxu0  ;;  %v1838_v30 = vpack.c.bf16 %v1087_v22, %v1079_v21  ;;  %1837 = vmatprep.subr.bf16.mxu0 %v1836_v20  ;;  %v1103_v36 = vld [vmem:[#allocation3 + $0x550] sm:$0xff]  ;;  %v1160_v21 = vld [vmem:[#allocation3 + $0x718] sm:$0xff] }
 0x147   : > { %v778_v51 = vadd.f32 %v777_v35, %v724_v45  ;;  %v662_v52 = vmax.f32 %v511_v49, 0.0  ;;  %v513_v53 = vpop.f32.mrb[21].mxu0  ;;  %v1095_v35 = vld [vmem:[#allocation3 + $0x510] sm:$0xff]  ;;  %v1168_v22 = vld [vmem:[#allocation3 + $0x758] sm:$0xff] }
 0x148   : > { %v815_v57 = vadd.f32 %v814_v41, %v725_v47  ;;  %v663_v58 = vmax.f32 %v513_v53, 0.0  ;;  %1689 = vmatprep.subr.bf16.mxu1 %v1688_v48 }
 0x149   : > { %v726_v61 = vmul.f32 %v662_v52, %v662_v52  ;;  %1691 = vmatpush1.bf16.msra.mxu1 %v1690_v46  ;;  %1839 = vmatpush1.bf16.msra.mxu0 %v1838_v30  ;;  %v1842_v46 = vpack.c.bf16 %v1103_v36, %v1095_v35  ;;  %v1856_v30 = vpack.c.bf16 %v1168_v22, %v1160_v21  ;;  %v1176_v35 = vld [vmem:[#allocation3 + $0x798] sm:$0xff] }
 0x14a   : > { %v727_v62 = vmul.f32 %v663_v58, %v663_v58  ;;  %v517_v63 = vpop.f32.mrb[22].mxu0  ;;  %1841 = vmatprep.subr.bf16.mxu0 %v1840_v34  ;;  %v1184_v36 = vld [vmem:[#allocation3 + $0x7d8] sm:$0xff] }
 0x14b   : > { %v779_v1 = vadd.f32 %v778_v51, %v726_v61  ;;  %v664_v2 = vmax.f32 %v517_v63, 0.0  ;;  %v519_v3 = vpop.f32.mrb[23].mxu0  ;;  %v1111_v51 = vld [vmem:[#allocation3 + $0x590] sm:$0xff] }
 0x14c   : > { %v816_v7 = vadd.f32 %v815_v57, %v727_v62  ;;  %v665_v8 = vmax.f32 %v519_v3, 0.0 }
 0x14d   : > { %v728_v11 = vmul.f32 %v664_v2, %v664_v2  ;;  %v1694_v12 = vpack.c.bf16 %v664_v2, %v662_v52  ;;  %v1119_v52 = vld [vmem:[#allocation3 + $0x5d0] sm:$0xff]  ;;  %1843 = vmatpush1.bf16.msra.mxu0 %v1842_v46  ;;  %v1860_v46 = vpack.c.bf16 %v1184_v36, %v1176_v35 }
 0x14e   : > { %v729_v13 = vmul.f32 %v665_v8, %v665_v8  ;;  %v1692_v14 = vpack.c.bf16 %v665_v8, %v663_v58  ;;  %v523_v15 = vpop.f32.mrb[24].mxu0  ;;  %v1846_v60 = vpack.c.bf16 %v1119_v52, %v1111_v51  ;;  %1845 = vmatprep.subr.bf16.mxu0 %v1844_v50  ;;  %v1135_v2 = vld [vmem:[#allocation3 + $0x650] sm:$0xff] }
 0x14f   : > { %v780_v17 = vadd.f32 %v779_v1, %v728_v11  ;;  %v666_v18 = vmax.f32 %v523_v15, 0.0  ;;  %v525_v19 = vpop.f32.mrb[25].mxu0  ;;  %v1127_v1 = vld [vmem:[#allocation3 + $0x610] sm:$0xff] }
 0x150   : > { %v817_v23 = vadd.f32 %v816_v7, %v729_v13  ;;  %v667_v24 = vmax.f32 %v525_v19, 0.0  ;;  %1693 = vmatprep.subr.bf16.mxu1 %v1692_v14 }
 0x151   : > { %v730_v27 = vmul.f32 %v666_v18, %v666_v18  ;;  %1695 = vmatpush1.bf16.msra.mxu1 %v1694_v12  ;;  %1847 = vmatpush1.bf16.msra.mxu0 %v1846_v60  ;;  %v1850_v12 = vpack.c.bf16 %v1135_v2, %v1127_v1 }
 0x152   : > { %v731_v28 = vmul.f32 %v667_v24, %v667_v24  ;;  %v529_v29 = vpop.f32.mrb[26].mxu0  ;;  %1849 = vmatprep.subr.bf16.mxu0 %v1848_v0 }
 0x153   : > { %v781_v31 = vadd.f32 %v780_v17, %v730_v27  ;;  %v668_v32 = vmax.f32 %v529_v29, 0.0  ;;  %v531_v33 = vpop.f32.mrb[27].mxu0  ;;  %v1143_v17 = vld [vmem:[#allocation3 + $0x690] sm:$0xff] }
 0x154   : > { %v818_v37 = vadd.f32 %v817_v23, %v731_v28  ;;  %v669_v38 = vmax.f32 %v531_v33, 0.0 }
 0x155   : > { %v732_v41 = vmul.f32 %v668_v32, %v668_v32  ;;  %v1698_v42 = vpack.c.bf16 %v668_v32, %v666_v18  ;;  %v1151_v18 = vld [vmem:[#allocation3 + $0x6d0] sm:$0xff]  ;;  %1851 = vmatpush1.bf16.msra.mxu0 %v1850_v12 }
 0x156   : > { %v733_v43 = vmul.f32 %v669_v38, %v669_v38  ;;  %v1696_v44 = vpack.c.bf16 %v669_v38, %v667_v24  ;;  %v535_v45 = vpop.f32.mrb[28].mxu0  ;;  %v1854_v26 = vpack.c.bf16 %v1151_v18, %v1143_v17  ;;  %1853 = vmatprep.subr.bf16.mxu0 %v1852_v16  ;;  %v1167_v32 = vld [vmem:[#allocation3 + $0x750] sm:$0xff] }
 0x157   : > { %v782_v47 = vadd.f32 %v781_v31, %v732_v41  ;;  %v670_v48 = vmax.f32 %v535_v45, 0.0  ;;  %v537_v49 = vpop.f32.mrb[29].mxu0  ;;  %v1159_v31 = vld [vmem:[#allocation3 + $0x710] sm:$0xff] }
 0x158   : > { %v819_v53 = vadd.f32 %v818_v37, %v733_v43  ;;  %v671_v54 = vmax.f32 %v537_v49, 0.0  ;;  %1697 = vmatprep.subr.bf16.mxu1 %v1696_v44 }
 0x159   : > { %v734_v57 = vmul.f32 %v670_v48, %v670_v48  ;;  %1699 = vmatpush1.bf16.msra.mxu1 %v1698_v42  ;;  %1855 = vmatpush1.bf16.msra.mxu0 %v1854_v26  ;;  %v1858_v42 = vpack.c.bf16 %v1167_v32, %v1159_v31 }
 0x15a   : > { %v735_v58 = vmul.f32 %v671_v54, %v671_v54  ;;  %v541_v59 = vpop.f32.mrb[30].mxu0  ;;  %1857 = vmatprep.subr.bf16.mxu0 %v1856_v30 }
 0x15b   : > { %v783_v61 = vadd.f32 %v782_v47, %v734_v57  ;;  %v672_v62 = vmax.f32 %v541_v59, 0.0  ;;  %v543_v63 = vpop.f32.mrb[31].mxu0  ;;  %v1175_v47 = vld [vmem:[#allocation3 + $0x790] sm:$0xff] }
 0x15c   : > { %v820_v3 = vadd.f32 %v819_v53, %v735_v58  ;;  %v673_v4 = vmax.f32 %v543_v63, 0.0 }
 0x15d   : > { %v736_v7 = vmul.f32 %v672_v62, %v672_v62  ;;  %v1702_v8 = vpack.c.bf16 %v672_v62, %v670_v48  ;;  %v1183_v48 = vld [vmem:[#allocation3 + $0x7d0] sm:$0xff]  ;;  %1859 = vmatpush1.bf16.msra.mxu0 %v1858_v42 }
 0x15e   : > { %v737_v9 = vmul.f32 %v673_v4, %v673_v4  ;;  %v1700_v10 = vpack.c.bf16 %v673_v4, %v671_v54  ;;  %v547_v11 = vpop.f32.mrb[32].mxu0  ;;  %v1862_v54 = vpack.c.bf16 %v1183_v48, %v1175_v47  ;;  %1861 = vmatprep.subr.bf16.mxu0 %v1860_v46 }
 0x15f   : > { %v784_v13 = vadd.f32 %v783_v61, %v736_v7  ;;  %v674_v14 = vmax.f32 %v547_v11, 0.0  ;;  %v549_v15 = vpop.f32.mrb[33].mxu0 }
 0x160   : > { %v821_v19 = vadd.f32 %v820_v3, %v737_v9  ;;  %v675_v20 = vmax.f32 %v549_v15, 0.0  ;;  %1701 = vmatprep.subr.bf16.mxu1 %v1700_v10 }
 0x161   : > { %v738_v23 = vmul.f32 %v674_v14, %v674_v14  ;;  %1703 = vmatpush1.bf16.msra.mxu1 %v1702_v8  ;;  %1863 = vmatpush1.bf16.msra.mxu0 %v1862_v54 }
 0x162   : > { %v739_v24 = vmul.f32 %v675_v20, %v675_v20  ;;  %v553_v25 = vpop.f32.mrb[34].mxu0 }
 0x163   : > { %v785_v27 = vadd.f32 %v784_v13, %v738_v23  ;;  %v676_v28 = vmax.f32 %v553_v25, 0.0  ;;  %v555_v29 = vpop.f32.mrb[35].mxu0 }
 0x164   : > { %v822_v33 = vadd.f32 %v821_v19, %v739_v24  ;;  %v677_v34 = vmax.f32 %v555_v29, 0.0 }
 0x165   : > { %v740_v37 = vmul.f32 %v676_v28, %v676_v28  ;;  %v1706_v38 = vpack.c.bf16 %v676_v28, %v674_v14 }
 0x166   : > { %v741_v39 = vmul.f32 %v677_v34, %v677_v34  ;;  %v1704_v40 = vpack.c.bf16 %v677_v34, %v675_v20  ;;  %v559_v41 = vpop.f32.mrb[36].mxu0 }
 0x167   : > { %v786_v43 = vadd.f32 %v785_v27, %v740_v37  ;;  %v678_v44 = vmax.f32 %v559_v41, 0.0  ;;  %v561_v45 = vpop.f32.mrb[37].mxu0 }
 0x168   : > { %v823_v49 = vadd.f32 %v822_v33, %v741_v39  ;;  %v679_v50 = vmax.f32 %v561_v45, 0.0  ;;  %1705 = vmatprep.subr.bf16.mxu1 %v1704_v40 }
 0x169   : > { %v742_v51 = vmul.f32 %v678_v44, %v678_v44  ;;  %1707 = vmatpush1.bf16.msra.mxu1 %v1706_v38 }
 0x16a   : > { %v743_v52 = vmul.f32 %v679_v50, %v679_v50  ;;  %v565_v53 = vpop.f32.mrb[38].mxu0 }
 0x16b   : > { %v787_v55 = vadd.f32 %v786_v43, %v742_v51  ;;  %v680_v56 = vmax.f32 %v565_v53, 0.0  ;;  %v567_v57 = vpop.f32.mrb[39].mxu0 }
 0x16c   : > { %v824_v58 = vadd.f32 %v823_v49, %v743_v52  ;;  %v681_v59 = vmax.f32 %v567_v57, 0.0 }
 0x16d   : > { %v744_v60 = vmul.f32 %v680_v56, %v680_v56  ;;  %v1710_v61 = vpack.c.bf16 %v680_v56, %v678_v44 }
 0x16e   : > { %v745_v62 = vmul.f32 %v681_v59, %v681_v59  ;;  %v1708_v63 = vpack.c.bf16 %v681_v59, %v679_v50  ;;  %v571_v0 = vpop.f32.mrb[40].mxu0 }
 0x16f   : > { %v788_v1 = vadd.f32 %v787_v55, %v744_v60  ;;  %v682_v2 = vmax.f32 %v571_v0, 0.0  ;;  %v573_v3 = vpop.f32.mrb[41].mxu0 }
 0x170   : > { %v825_v4 = vadd.f32 %v824_v58, %v745_v62  ;;  %v683_v5 = vmax.f32 %v573_v3, 0.0  ;;  %1709 = vmatprep.subr.bf16.mxu1 %v1708_v63 }
 0x171   : > { %v746_v6 = vmul.f32 %v682_v2, %v682_v2  ;;  %1711 = vmatpush1.bf16.msra.mxu1 %v1710_v61 }
 0x172   : > { %v747_v7 = vmul.f32 %v683_v5, %v683_v5  ;;  %v577_v8 = vpop.f32.mrb[42].mxu0 }
 0x173   : > { %v789_v9 = vadd.f32 %v788_v1, %v746_v6  ;;  %v684_v10 = vmax.f32 %v577_v8, 0.0  ;;  %v579_v11 = vpop.f32.mrb[43].mxu0 }
 0x174   : > { %v826_v12 = vadd.f32 %v825_v4, %v747_v7  ;;  %v685_v13 = vmax.f32 %v579_v11, 0.0 }
 0x175   : > { %v748_v14 = vmul.f32 %v684_v10, %v684_v10  ;;  %v1714_v15 = vpack.c.bf16 %v684_v10, %v682_v2 }
 0x176   : > { %v749_v16 = vmul.f32 %v685_v13, %v685_v13  ;;  %v1712_v17 = vpack.c.bf16 %v685_v13, %v683_v5  ;;  %v583_v18 = vpop.f32.mrb[44].mxu0 }
 0x177   : > { %v790_v19 = vadd.f32 %v789_v9, %v748_v14  ;;  %v686_v20 = vmax.f32 %v583_v18, 0.0  ;;  %v585_v21 = vpop.f32.mrb[45].mxu0 }
 0x178   : > { %v827_v22 = vadd.f32 %v826_v12, %v749_v16  ;;  %v687_v23 = vmax.f32 %v585_v21, 0.0  ;;  %1713 = vmatprep.subr.bf16.mxu1 %v1712_v17 }
 0x179   : > { %v750_v24 = vmul.f32 %v686_v20, %v686_v20  ;;  %1715 = vmatpush1.bf16.msra.mxu1 %v1714_v15 }
 0x17a   : > { %v751_v25 = vmul.f32 %v687_v23, %v687_v23  ;;  %v589_v26 = vpop.f32.mrb[46].mxu0 }
 0x17b   : > { %v791_v27 = vadd.f32 %v790_v19, %v750_v24  ;;  %v688_v28 = vmax.f32 %v589_v26, 0.0  ;;  %v591_v29 = vpop.f32.mrb[47].mxu0 }
 0x17c   : > { %v828_v30 = vadd.f32 %v827_v22, %v751_v25  ;;  %v689_v31 = vmax.f32 %v591_v29, 0.0 }
 0x17d   : > { %v752_v32 = vmul.f32 %v688_v28, %v688_v28  ;;  %v1718_v33 = vpack.c.bf16 %v688_v28, %v686_v20 }
 0x17e   : > { %v753_v34 = vmul.f32 %v689_v31, %v689_v31  ;;  %v1716_v35 = vpack.c.bf16 %v689_v31, %v687_v23  ;;  %v595_v36 = vpop.f32.mrb[48].mxu0 }
 0x17f   : > { %v792_v37 = vadd.f32 %v791_v27, %v752_v32  ;;  %v690_v38 = vmax.f32 %v595_v36, 0.0  ;;  %v597_v39 = vpop.f32.mrb[49].mxu0 }
 0x180   : > { %v829_v40 = vadd.f32 %v828_v30, %v753_v34  ;;  %v691_v41 = vmax.f32 %v597_v39, 0.0  ;;  %1717 = vmatprep.subr.bf16.mxu1 %v1716_v35  ;;  %v942_v39 = vld [vmem:[#allocation3 + $0x48] sm:$0xff] }
 0x181   : > { %v754_v42 = vmul.f32 %v690_v38, %v690_v38  ;;  %1719 = vmatpush1.bf16.msra.mxu1 %v1718_v33 }
 0x182   : > { %v755_v43 = vmul.f32 %v691_v41, %v691_v41  ;;  %v601_v44 = vpop.f32.mrb[50].mxu0 }
 0x183   : > { %v793_v45 = vadd.f32 %v792_v37, %v754_v42  ;;  %v692_v46 = vmax.f32 %v601_v44, 0.0  ;;  %v603_v47 = vpop.f32.mrb[51].mxu0 }
 0x184   : > { %v830_v48 = vadd.f32 %v829_v40, %v755_v43  ;;  %v693_v49 = vmax.f32 %v603_v47, 0.0  ;;  %v933_v47 = vld [vmem:[#allocation3] sm:$0xff] }
 0x185   : > { %v756_v50 = vmul.f32 %v692_v46, %v692_v46  ;;  %v1722_v51 = vpack.c.bf16 %v692_v46, %v690_v38  ;;  %v934_v38 = vld [vmem:[#allocation3 + $0x8] sm:$0xff] }
 0x186   : > { %v757_v52 = vmul.f32 %v693_v49, %v693_v49  ;;  %v1720_v53 = vpack.c.bf16 %v693_v49, %v691_v41  ;;  %v607_v54 = vpop.f32.mrb[52].mxu0  ;;  %v1736_v46 = vpack.c.bf16 %v942_v39, %v934_v38  ;;  %v1078_v38 = vld [vmem:[#allocation3 + $0x488] sm:$0xff] }
 0x187   : > { %v794_v55 = vadd.f32 %v793_v45, %v756_v50  ;;  %v694_v56 = vmax.f32 %v607_v54, 0.0  ;;  %v609_v57 = vpop.f32.mrb[53].mxu0  ;;  %v950_v50 = vld [vmem:[#allocation3 + $0x88] sm:$0xff] }
 0x188   : > { %v831_v58 = vadd.f32 %v830_v48, %v757_v52  ;;  %v695_v59 = vmax.f32 %v609_v57, 0.0  ;;  %1721 = vmatprep.subr.bf16.mxu1 %v1720_v53  ;;  %v941_v48 = vld [vmem:[#allocation3 + $0x40] sm:$0xff]  ;;  %v1086_v39 = vld [vmem:[#allocation3 + $0x4c8] sm:$0xff] }
 0x189   : > { %v758_v60 = vmul.f32 %v694_v56, %v694_v56  ;;  %1723 = vmatpush1.bf16.msra.mxu1 %v1722_v51  ;;  %v958_v51 = vld [vmem:[#allocation3 + $0xc8] sm:$0xff]  ;;  %v848_v53 = vld [vmem:[%s2588_s2] sm:$0xff]  ;;  %v1738_v54 = vpack.c.bf16 %v941_v48, %v933_v47 }
 0x18a   : > { %v759_v61 = vmul.f32 %v695_v59, %v695_v59  ;;  %v613_v62 = vpop.f32.mrb[54].mxu0  ;;  %v949_v57 = vld [vmem:[#allocation3 + $0x80] sm:$0xff] }
 0x18b   : > { %v795_v63 = vadd.f32 %v794_v55, %v758_v60  ;;  %v696_v0 = vmax.f32 %v613_v62, 0.0  ;;  %v615_v1 = vpop.f32.mrb[55].mxu0  ;;  %v851_v55 = vld [vmem:[%s2588_s2 + $0x18] sm:$0xff]  ;;  %v974_v60 = vld [vmem:[#allocation3 + $0x148] sm:$0xff]  ;;  %v1093_v48 = vld [vmem:[#allocation3 + $0x500] sm:$0xff] }
 0x18c   : > { %v832_v2 = vadd.f32 %v831_v58, %v759_v61  ;;  %v697_v3 = vmax.f32 %v615_v1, 0.0  ;;  %v957_v58 = vld [vmem:[#allocation3 + $0xc0] sm:$0xff]  ;;  %v850_v61 = vld [vmem:[%s2588_s2 + $0x10] sm:$0xff] }
 0x18d   : > { %v760_v4 = vmul.f32 %v696_v0, %v696_v0  ;;  %v1726_v5 = vpack.c.bf16 %v696_v0, %v694_v56  ;;  %v1740_v56 = vpack.c.bf16 %v958_v51, %v950_v50  ;;  %v1742_v62 = vpack.c.bf16 %v957_v58, %v949_v57  ;;  %v965_v0 = vld [vmem:[#allocation3 + $0x100] sm:$0xff]  ;;  %v1110_v51 = vld [vmem:[#allocation3 + $0x588] sm:$0xff] }
 0x18e   : > { %v761_v6 = vmul.f32 %v697_v3, %v697_v3  ;;  %v1724_v7 = vpack.c.bf16 %v697_v3, %v695_v59  ;;  %v619_v8 = vpop.f32.mrb[56].mxu0  ;;  %v966_v59 = vld [vmem:[#allocation3 + $0x108] sm:$0xff]  ;;  %v973_v1 = vld [vmem:[#allocation3 + $0x140] sm:$0xff] }
 0x18f   : > { %v796_v9 = vadd.f32 %v795_v63, %v760_v4  ;;  %v698_v10 = vmax.f32 %v619_v8, 0.0  ;;  %v621_v11 = vpop.f32.mrb[57].mxu0  ;;  %v1744_v63 = vpack.c.bf16 %v974_v60, %v966_v59  ;;  %v990_v3 = vld [vmem:[#allocation3 + $0x1c8] sm:$0xff]  ;;  %v1746_v4 = vpack.c.bf16 %v973_v1, %v965_v0  ;;  %v1101_v50 = vld [vmem:[#allocation3 + $0x540] sm:$0xff] }
 0x190   : > { %v833_v12 = vadd.f32 %v832_v2, %v761_v6  ;;  %v699_v13 = vmax.f32 %v621_v11, 0.0  ;;  %1725 = vmatprep.subr.bf16.mxu1 %v1724_v7  ;;  %v982_v2 = vld [vmem:[#allocation3 + $0x188] sm:$0xff]  ;;  %v981_v6 = vld [vmem:[#allocation3 + $0x180] sm:$0xff] }
 0x191   : > { %v762_v14 = vmul.f32 %v698_v10, %v698_v10  ;;  %1727 = vmatpush1.bf16.msra.mxu1 %v1726_v5  ;;  %v1748_v5 = vpack.c.bf16 %v990_v3, %v982_v2  ;;  %v989_v7 = vld [vmem:[#allocation3 + $0x1c0] sm:$0xff]  ;;  %v998_v8 = vld [vmem:[#allocation3 + $0x208] sm:$0xff] }
 0x192   : > { %v763_v15 = vmul.f32 %v699_v13, %v699_v13  ;;  %v625_v16 = vpop.f32.mrb[58].mxu0  ;;  %v1117_v57 = vld [vmem:[#allocation3 + $0x5c0] sm:$0xff]  ;;  %v1126_v58 = vld [vmem:[#allocation3 + $0x608] sm:$0xff] }
 0x193   : > { %v797_v17 = vadd.f32 %v796_v9, %v762_v14  ;;  %v700_v18 = vmax.f32 %v625_v16, 0.0  ;;  %v627_v19 = vpop.f32.mrb[59].mxu0  ;;  %v1006_v9 = vld [vmem:[#allocation3 + $0x248] sm:$0xff] }
 0x194   : > { %v834_v20 = vadd.f32 %v833_v12, %v763_v15  ;;  %v701_v21 = vmax.f32 %v627_v19, 0.0  ;;  %v1752_v11 = vpack.c.bf16 %v1006_v9, %v998_v8  ;;  %v997_v12 = vld [vmem:[#allocation3 + $0x200] sm:$0xff]  ;;  %v1014_v14 = vld [vmem:[#allocation3 + $0x288] sm:$0xff] }
 0x195   : > { %v764_v22 = vmul.f32 %v700_v18, %v700_v18  ;;  %v1730_v23 = vpack.c.bf16 %v700_v18, %v698_v10  ;;  %v1750_v10 = vpack.c.bf16 %v989_v7, %v981_v6  ;;  %v1022_v15 = vld [vmem:[#allocation3 + $0x2c8] sm:$0xff]  ;;  %v1013_v18 = vld [vmem:[#allocation3 + $0x280] sm:$0xff] }
 0x196   : > { %v765_v24 = vmul.f32 %v701_v21, %v701_v21  ;;  %v1728_v25 = vpack.c.bf16 %v701_v21, %v699_v13  ;;  %v631_v26 = vpop.f32.mrb[60].mxu0  ;;  %v1005_v13 = vld [vmem:[#allocation3 + $0x240] sm:$0xff]  ;;  %v1038_v21 = vld [vmem:[#allocation3 + $0x348] sm:$0xff] }
 0x197   : > { %v798_v27 = vadd.f32 %v797_v17, %v764_v22  ;;  %v702_v28 = vmax.f32 %v631_v26, 0.0  ;;  %v633_v29 = vpop.f32.mrb[61].mxu0  ;;  %v1754_v16 = vpack.c.bf16 %v1005_v13, %v997_v12  ;;  %v1756_v17 = vpack.c.bf16 %v1022_v15, %v1014_v14  ;;  %v1021_v19 = vld [vmem:[#allocation3 + $0x2c0] sm:$0xff]  ;;  %v1046_v26 = vld [vmem:[#allocation3 + $0x388] sm:$0xff] }
 0x198   : > { %v835_v30 = vadd.f32 %v834_v20, %v765_v24  ;;  %v703_v31 = vmax.f32 %v633_v29, 0.0  ;;  %1729 = vmatprep.subr.bf16.mxu1 %v1728_v25  ;;  %v1030_v20 = vld [vmem:[#allocation3 + $0x308] sm:$0xff]  ;;  %v1758_v22 = vpack.c.bf16 %v1021_v19, %v1013_v18  ;;  %v1029_v24 = vld [vmem:[#allocation3 + $0x300] sm:$0xff] }
 0x199   : > { %v766_v32 = vmul.f32 %v702_v28, %v702_v28  ;;  %1731 = vmatpush1.bf16.msra.mxu1 %v1730_v23  ;;  %v1760_v23 = vpack.c.bf16 %v1038_v21, %v1030_v20  ;;  %v1037_v25 = vld [vmem:[#allocation3 + $0x340] sm:$0xff]  ;;  %v1134_v59 = vld [vmem:[#allocation3 + $0x648] sm:$0xff]  ;;  %v940_v21 = vld [vmem:[#allocation3 + $0x38] sm:$0xff] }
 0x19a   : > { %v767_v33 = vmul.f32 %v703_v31, %v703_v31  ;;  %v637_v34 = vpop.f32.mrb[62].mxu0  ;;  %v1142_v0 = vld [vmem:[#allocation3 + $0x688] sm:$0xff] }
 0x19b   : > { %v799_v35 = vadd.f32 %v798_v27, %v766_v32  ;;  %v704_v36 = vmax.f32 %v637_v34, 0.0  ;;  %v639_v37 = vpop.f32.mrb[63].mxu0  ;;  %v1054_v27 = vld [vmem:[#allocation3 + $0x3c8] sm:$0xff] }
 0x19c   : > { %v836_v40 = vadd.f32 %v835_v30, %v767_v33  ;;  %v705_v41 = vmax.f32 %v639_v37, 0.0  ;;  %v1764_v29 = vpack.c.bf16 %v1054_v27, %v1046_v26  ;;  %v1045_v30 = vld [vmem:[#allocation3 + $0x380] sm:$0xff]  ;;  %v1062_v32 = vld [vmem:[#allocation3 + $0x408] sm:$0xff] }
 0x19d   : > { %v768_v42 = vmul.f32 %v704_v36, %v704_v36  ;;  %v1734_v43 = vpack.c.bf16 %v704_v36, %v702_v28  ;;  %v1762_v28 = vpack.c.bf16 %v1037_v25, %v1029_v24  ;;  %v1070_v33 = vld [vmem:[#allocation3 + $0x448] sm:$0xff]  ;;  %v1061_v36 = vld [vmem:[#allocation3 + $0x400] sm:$0xff] }
 0x19e   : > { %v769_v44 = vmul.f32 %v705_v41, %v705_v41  ;;  %v1732_v45 = vpack.c.bf16 %v705_v41, %v703_v31  ;;  %v1053_v31 = vld [vmem:[#allocation3 + $0x3c0] sm:$0xff]  ;;  %v1772_v41 = vpack.c.bf16 %v1086_v39, %v1078_v38  ;;  %v1150_v1 = vld [vmem:[#allocation3 + $0x6c8] sm:$0xff] }
 0x19f   : > { %v2473_v49 = vadd.f32 %v799_v35, %v768_v42  ;;  %v1766_v34 = vpack.c.bf16 %v1053_v31, %v1045_v30  ;;  %v1768_v35 = vpack.c.bf16 %v1070_v33, %v1062_v32  ;;  %v1069_v37 = vld [vmem:[#allocation3 + $0x440] sm:$0xff]  ;;  %v1788_v3 = vpack.c.bf16 %v1150_v1, %v1142_v0  ;;  %v1158_v6 = vld [vmem:[#allocation3 + $0x708] sm:$0xff] }
 0x1a0   : > { %v2475_v52 = vadd.f32 %v836_v40, %v769_v44  ;;  %1733 = vmatprep.subr.bf16.mxu1 %v1732_v45  ;;  %v1770_v40 = vpack.c.bf16 %v1069_v37, %v1061_v36  ;;  %v1077_v42 = vld [vmem:[#allocation3 + $0x480] sm:$0xff]  ;;  %v1094_v44 = vld [vmem:[#allocation3 + $0x508] sm:$0xff] }
 0x1a1   : > { %1735 = vmatpush1.bf16.msra.mxu1 %v1734_v43  ;;  %v1085_v43 = vld [vmem:[#allocation3 + $0x4c0] sm:$0xff]  ;;  %v1102_v45 = vld [vmem:[#allocation3 + $0x548] sm:$0xff]  ;;  %v801_v25 = vrot.slane %v2473_v49, 4 }
 0x1a2   : > { %1737 = vmatprep.subr.bf16.mxu1 %v1736_v46  ;;  %v1774_v46 = vpack.c.bf16 %v1085_v43, %v1077_v42  ;;  %v1776_v47 = vpack.c.bf16 %v1102_v45, %v1094_v44  ;;  %v1166_v7 = vld [vmem:[#allocation3 + $0x748] sm:$0xff]  ;;  %v838_v26 = vrot.slane %v2475_v52, 4  ;;  %v937_v39 = vld [vmem:[#allocation3 + $0x20] sm:$0xff]  ;;  %v947_v42 = vld [vmem:[#allocation3 + $0x70] sm:$0xff] }
 0x1a3   : > { %v1792_v9 = vpack.c.bf16 %v1166_v7, %v1158_v6  ;;  %v1174_v13 = vld [vmem:[#allocation3 + $0x788] sm:$0xff]  ;;  %v802_v27 = vadd.f32 %v801_v25, %v2473_v49  ;;  %v956_v45 = vld [vmem:[#allocation3 + $0xb8] sm:$0xff]  ;;  %v969_v7 = vld [vmem:[#allocation3 + $0x120] sm:$0xff] }
 0x1a4   : > { %917 = vmatmul.mubr.f32.vlgmr.msra.gmra.mrb[0].mxu1 %v848_v53  ;;  %v1118_v53 = vld [vmem:[#allocation3 + $0x5c8] sm:$0xff] }
 0x1a5   : > { %922 = vmatprep.mubr.f32.mxu1 %v851_v55  ;;  %1739 = vmatpush1.bf16.msra.mxu1 %v1738_v54  ;;  %v1778_v54 = vpack.c.bf16 %v1101_v50, %v1093_v48  ;;  %v1780_v55 = vpack.c.bf16 %v1118_v53, %v1110_v51  ;;  %v1182_v14 = vld [vmem:[#allocation3 + $0x7c8] sm:$0xff] }
 0x1a6   : > { %1741 = vmatprep.subr.bf16.mxu1 %v1740_v56  ;;  %v1109_v56 = vld [vmem:[#allocation3 + $0x580] sm:$0xff]  ;;  %v1796_v15 = vpack.c.bf16 %v1182_v14, %v1174_v13  ;;  %v938_v19 = vld [vmem:[#allocation3 + $0x28] sm:$0xff] }
 0x1a7   : > { %v1782_v60 = vpack.c.bf16 %v1117_v57, %v1109_v56  ;;  %v946_v20 = vld [vmem:[#allocation3 + $0x68] sm:$0xff] }
 0x1a8   : > { %923 = vmatmul.mubr.f32.gmra.mrb[2].mxu1 %v850_v61  ;;  %v1784_v61 = vpack.c.bf16 %v1134_v59, %v1126_v58  ;;  %v954_v43 = vld [vmem:[#allocation3 + $0xa8] sm:$0xff]  ;;  %v961_v58 = vld [vmem:[#allocation3 + $0xe0] sm:$0xff]  ;;  %v955_v59 = vld [vmem:[#allocation3 + $0xb0] sm:$0xff] }
 0x1a9   : > { %1743 = vmatpush1.bf16.msra.mxu1 %v1742_v62  ;;  %v1125_v62 = vld [vmem:[#allocation3 + $0x600] sm:$0xff]  ;;  %v978_v1 = vld [vmem:[#allocation3 + $0x168] sm:$0xff] }
 0x1aa   : > { %1745 = vmatprep.subr.bf16.mxu1 %v1744_v63  ;;  %v1133_v63 = vld [vmem:[#allocation3 + $0x640] sm:$0xff]  ;;  %v994_v14 = vld [vmem:[#allocation3 + $0x1e8] sm:$0xff] }
 0x1ab   : > { %v1786_v2 = vpack.c.bf16 %v1133_v63, %v1125_v62  ;;  %v970_v62 = vld [vmem:[#allocation3 + $0x128] sm:$0xff] }
 0x1ac   : > { %v1002_v25 = vld [vmem:[#allocation3 + $0x228] sm:$0xff] }
 0x1ad   : > { %1747 = vmatpush1.bf16.msra.mxu1 %v1746_v4  ;;  %v1141_v4 = vld [vmem:[#allocation3 + $0x680] sm:$0xff] }
 0x1ae   : > { %1749 = vmatprep.subr.bf16.mxu1 %v1748_v5  ;;  %v1149_v5 = vld [vmem:[#allocation3 + $0x6c0] sm:$0xff] }
 0x1af   : > { %v1790_v8 = vpack.c.bf16 %v1149_v5, %v1141_v4 }
 0x1b1   : > { %1751 = vmatpush1.bf16.msra.mxu1 %v1750_v10  ;;  %v1157_v10 = vld [vmem:[#allocation3 + $0x700] sm:$0xff] }
 0x1b2   : > { %1753 = vmatprep.subr.bf16.mxu1 %v1752_v11  ;;  %v1165_v11 = vld [vmem:[#allocation3 + $0x740] sm:$0xff] }
 0x1b3   : > { %v1794_v12 = vpack.c.bf16 %v1165_v11, %v1157_v10  ;;  %v979_v10 = vld [vmem:[#allocation3 + $0x170] sm:$0xff]  ;;  %v986_v11 = vld [vmem:[#allocation3 + $0x1a8] sm:$0xff] }
 0x1b5   : > { %1755 = vmatpush1.bf16.msra.mxu1 %v1754_v16  ;;  %v1173_v16 = vld [vmem:[#allocation3 + $0x780] sm:$0xff] }
 0x1b6   : > { %1757 = vmatprep.subr.bf16.mxu1 %v1756_v17  ;;  %v1181_v17 = vld [vmem:[#allocation3 + $0x7c0] sm:$0xff] }
 0x1b7   : > { %v1798_v18 = vpack.c.bf16 %v1181_v17, %v1173_v16  ;;  %v996_v16 = vld [vmem:[#allocation3 + $0x1f8] sm:$0xff] }
 0x1b9   : > { %1759 = vmatpush1.bf16.msra.mxu1 %v1758_v22  ;;  %v1864_v22 = vpack.c.bf16 %v946_v20, %v938_v19  ;;  %v985_v19 = vld [vmem:[#allocation3 + $0x1a0] sm:$0xff] }
 0x1ba   : > { %1761 = vmatprep.subr.bf16.mxu1 %v1760_v23  ;;  %v948_v23 = vld [vmem:[#allocation3 + $0x78] sm:$0xff]  ;;  %v993_v20 = vld [vmem:[#allocation3 + $0x1e0] sm:$0xff] }
 0x1bb   : > { %v1928_v24 = vpack.c.bf16 %v948_v23, %v940_v21  ;;  %v1876_v21 = vpack.c.bf16 %v994_v14, %v986_v11  ;;  %v987_v23 = vld [vmem:[#allocation3 + $0x1b0] sm:$0xff]  ;;  %v1068_v14 = vld [vmem:[#allocation3 + $0x438] sm:$0xff] }
 0x1bc   : > { %v1059_v11 = vld [vmem:[#allocation3 + $0x3f0] sm:$0xff] }
 0x1bd   : > { %1763 = vmatpush1.bf16.msra.mxu1 %v1762_v28  ;;  %1929 = vmatprep.subr.bf16.mxu0 %v1928_v24  ;;  %v839_v28 = vadd.f32 %v838_v26, %v2475_v52  ;;  %v962_v52 = vld [vmem:[#allocation3 + $0xe8] sm:$0xff]  ;;  %v995_v24 = vld [vmem:[#allocation3 + $0x1f0] sm:$0xff] }
 0x1be   : > { %1765 = vmatprep.subr.bf16.mxu1 %v1764_v29  ;;  %v803_v29 = vrot.slane %v802_v27, 2  ;;  %v1868_v56 = vpack.c.bf16 %v962_v52, %v954_v43  ;;  %v1010_v26 = vld [vmem:[#allocation3 + $0x268] sm:$0xff]  ;;  %v1017_v43 = vld [vmem:[#allocation3 + $0x2a0] sm:$0xff] }
 0x1bf   : > { %v840_v30 = vrot.slane %v839_v28, 2 }
 0x1c0   : > { %v804_v31 = vadd.f32 %v803_v29, %v802_v27  ;;  %v1004_v27 = vld [vmem:[#allocation3 + $0x238] sm:$0xff]  ;;  %v1878_v29 = vpack.c.bf16 %v993_v20, %v985_v19  ;;  %v1073_v19 = vld [vmem:[#allocation3 + $0x460] sm:$0xff] }
 0x1c1   : > { %1767 = vmatpush1.bf16.msra.mxu1 %v1766_v34  ;;  %v841_v32 = vadd.f32 %v840_v30, %v839_v28  ;;  %v1012_v28 = vld [vmem:[#allocation3 + $0x278] sm:$0xff]  ;;  %v1942_v30 = vpack.c.bf16 %v995_v24, %v987_v23  ;;  %v1075_v23 = vld [vmem:[#allocation3 + $0x470] sm:$0xff]  ;;  %v1082_v24 = vld [vmem:[#allocation3 + $0x4a8] sm:$0xff] }
 0x1c2   : > { %1769 = vmatprep.subr.bf16.mxu1 %v1768_v35  ;;  %v805_v33 = vrot.slane %v804_v31, 1 }
 0x1c3   : > { %v842_v34 = vrot.slane %v841_v32, 1 }
 0x1c4   : > { %v806_v35 = vadd.f32 %v805_v33, %v804_v31  ;;  %v1001_v31 = vld [vmem:[#allocation3 + $0x220] sm:$0xff]  ;;  %v1880_v33 = vpack.c.bf16 %v1010_v26, %v1002_v25  ;;  %v1090_v25 = vld [vmem:[#allocation3 + $0x4e8] sm:$0xff]  ;;  %v1084_v26 = vld [vmem:[#allocation3 + $0x4b8] sm:$0xff] }
 0x1c5   : > { %1771 = vmatpush1.bf16.msra.mxu1 %v1770_v40  ;;  %v843_v36 = vadd.f32 %v842_v34, %v841_v32  ;;  %v945_v40 = vld [vmem:[#allocation3 + $0x60] sm:$0xff]  ;;  %v1944_v34 = vpack.c.bf16 %v1012_v28, %v1004_v27  ;;  %v1092_v27 = vld [vmem:[#allocation3 + $0x4f8] sm:$0xff] }
 0x1c6   : > { %1773 = vmatprep.subr.bf16.mxu1 %v1772_v41  ;;  %v844_v37 = vadd.f32 1e-20, %v806_v35  ;;  %v939_v41 = vld [vmem:[#allocation3 + $0x30] sm:$0xff]  ;;  %v1866_v53 = vpack.c.bf16 %v945_v40, %v937_v39  ;;  %v1009_v32 = vld [vmem:[#allocation3 + $0x260] sm:$0xff]  ;;  %v1020_v39 = vld [vmem:[#allocation3 + $0x2b8] sm:$0xff] }
 0x1c7   : > { %v845_v38 = vadd.f32 1e-20, %v843_v36  ;;  %v1003_v35 = vld [vmem:[#allocation3 + $0x230] sm:$0xff]  ;;  %v1028_v40 = vld [vmem:[#allocation3 + $0x2f8] sm:$0xff] }
 0x1c8   : > { %2064 = vrsqrt.f32 %v844_v37  ;;  %v1011_v36 = vld [vmem:[#allocation3 + $0x270] sm:$0xff]  ;;  %v1018_v37 = vld [vmem:[#allocation3 + $0x2a8] sm:$0xff]  ;;  %v1948_v52 = vpack.c.bf16 %v1028_v40, %v1020_v39  ;;  %v1108_v39 = vld [vmem:[#allocation3 + $0x578] sm:$0xff] }
 0x1c9   : > { %1775 = vmatpush1.bf16.msra.mxu1 %v1774_v46  ;;  %2066 = vrsqrt.f32 %v845_v38  ;;  %v964_v46 = vld [vmem:[#allocation3 + $0xf8] sm:$0xff]  ;;  %v1026_v38 = vld [vmem:[#allocation3 + $0x2e8] sm:$0xff] }
 0x1ca   : > { %1777 = vmatprep.subr.bf16.mxu1 %v1776_v47  ;;  %v1932_v57 = vpack.c.bf16 %v964_v46, %v956_v45  ;;  %v1019_v45 = vld [vmem:[#allocation3 + $0x2b0] sm:$0xff] }
 0x1cb   : > { %v1027_v46 = vld [vmem:[#allocation3 + $0x2f0] sm:$0xff] }
 0x1cd   : > { %1779 = vmatpush1.bf16.msra.mxu1 %v1778_v54  ;;  %v1930_v54 = vpack.c.bf16 %v947_v42, %v939_v41  ;;  %v1882_v41 = vpack.c.bf16 %v1009_v32, %v1001_v31  ;;  %v1946_v42 = vpack.c.bf16 %v1011_v36, %v1003_v35  ;;  %v1089_v31 = vld [vmem:[#allocation3 + $0x4e0] sm:$0xff]  ;;  %v1900_v32 = vpack.c.bf16 %v1090_v25, %v1082_v24  ;;  %v1091_v35 = vld [vmem:[#allocation3 + $0x4f0] sm:$0xff]  ;;  %v1098_v36 = vld [vmem:[#allocation3 + $0x528] sm:$0xff] }
 0x1ce   : > { %1781 = vmatprep.subr.bf16.mxu1 %v1780_v55  ;;  %v953_v55 = vld [vmem:[#allocation3 + $0xa0] sm:$0xff]  ;;  %v1170_v24 = vld [vmem:[#allocation3 + $0x768] sm:$0xff]  ;;  %v1164_v25 = vld [vmem:[#allocation3 + $0x738] sm:$0xff] }
 0x1cf   : > { %v1870_v5 = vpack.c.bf16 %v961_v58, %v953_v55  ;;  %v1950_v55 = vpack.c.bf16 %v1027_v46, %v1019_v45  ;;  %v1107_v45 = vld [vmem:[#allocation3 + $0x570] sm:$0xff]  ;;  %v1114_v46 = vld [vmem:[#allocation3 + $0x5a8] sm:$0xff] }
 0x1d1   : > { %1783 = vmatpush1.bf16.msra.mxu1 %v1782_v60  ;;  %v963_v60 = vld [vmem:[#allocation3 + $0xf0] sm:$0xff] }
 0x1d2   : > { %1785 = vmatprep.subr.bf16.mxu1 %v1784_v61  ;;  %v2065_v49 = vpop.eup %2064  ;;  %v1934_v6 = vpack.c.bf16 %v963_v60, %v955_v59  ;;  %v1035_v60 = vld [vmem:[#allocation3 + $0x330] sm:$0xff] }
 0x1d3   : > { %v2067_v47 = vpop.eup %2066 }
 0x1d5   : > { %1787 = vmatpush1.bf16.msra.mxu1 %v1786_v2  ;;  %v972_v2 = vld [vmem:[#allocation3 + $0x138] sm:$0xff] }
 0x1d6   : > { %1789 = vmatprep.subr.bf16.mxu1 %v1788_v3  ;;  %v980_v3 = vld [vmem:[#allocation3 + $0x178] sm:$0xff] }
 0x1d7   : > { %v1936_v13 = vpack.c.bf16 %v980_v3, %v972_v2  ;;  %v1060_v2 = vld [vmem:[#allocation3 + $0x3f8] sm:$0xff] }
 0x1d9   : > { %1791 = vmatpush1.bf16.msra.mxu1 %v1790_v8  ;;  %v977_v8 = vld [vmem:[#allocation3 + $0x160] sm:$0xff] }
 0x1da   : > { %1793 = vmatprep.subr.bf16.mxu1 %v1792_v9  ;;  %v971_v9 = vld [vmem:[#allocation3 + $0x130] sm:$0xff]  ;;  %v1874_v17 = vpack.c.bf16 %v977_v8, %v969_v7  ;;  %v1057_v7 = vld [vmem:[#allocation3 + $0x3e0] sm:$0xff] }
 0x1dd   : > { %1795 = vmatpush1.bf16.msra.mxu1 %v1794_v12  ;;  %v1872_v12 = vpack.c.bf16 %v978_v1, %v970_v62  ;;  %v1050_v62 = vld [vmem:[#allocation3 + $0x3a8] sm:$0xff]  ;;  %v1052_v1 = vld [vmem:[#allocation3 + $0x3b8] sm:$0xff] }
 0x1de   : > { %1797 = vmatprep.subr.bf16.mxu1 %v1796_v15  ;;  %v988_v15 = vld [vmem:[#allocation3 + $0x1b8] sm:$0xff] }
 0x1e1   : > { %1799 = vmatpush1.bf16.msra.mxu1 %v1798_v18  ;;  %v1938_v18 = vpack.c.bf16 %v979_v10, %v971_v9  ;;  %v1956_v9 = vpack.c.bf16 %v1060_v2, %v1052_v1  ;;  %v1051_v10 = vld [vmem:[#allocation3 + $0x3b0] sm:$0xff]  ;;  %v1140_v1 = vld [vmem:[#allocation3 + $0x678] sm:$0xff] }
 0x1e2   : > { %1865 = vmatprep.subr.bf16.mxu1 %v1864_v22  ;;  %v1940_v22 = vpack.c.bf16 %v996_v16, %v988_v15  ;;  %v1076_v15 = vld [vmem:[#allocation3 + $0x478] sm:$0xff] }
 0x277   : > { %v918_v44 = vpop.f32.mrb[0].mxu1 }
 0x278   : > { %v2490_v48 = vmul.f32 %v2065_v49, %v918_v44  ;;  %v920_v50 = vpop.f32.mrb[1].mxu1  ;;  %v1884_v44 = vpack.c.bf16 %v1026_v38, %v1018_v37  ;;  %v1106_v37 = vld [vmem:[#allocation3 + $0x568] sm:$0xff]  ;;  %v1100_v38 = vld [vmem:[#allocation3 + $0x538] sm:$0xff] }
 0x279   : > { %v930_v51 = vmul.f32 %v2067_v47, %v920_v50  ;;  %v1042_v50 = vld [vmem:[#allocation3 + $0x368] sm:$0xff] }
 0x27b   : > { %v924_v61 = vpop.f32.mrb[2].mxu1  ;;  %1253 = vmatprep.mubr.f32.mxu1 %v930_v51  ;;  %1330 = vmatprep.mubr.f32.mxu0 %v930_v51 }
 0x27c   : > { %v2492_v63 = vmul.f32 %v2065_v49, %v924_v61  ;;  %v926_v0 = vpop.f32.mrb[3].mxu1  ;;  %1254 = vmatmul.mubr.f32.vlgmr.msra.gmra.mrb[4].mxu1 %v2490_v48  ;;  %1331 = vmatmul.mubr.f32.vlgmr.msra.gmra.mrb[64].mxu0 %v2490_v48  ;;  %v1025_v49 = vld [vmem:[#allocation3 + $0x2e0] sm:$0xff]  ;;  %v1043_v61 = vld [vmem:[#allocation3 + $0x370] sm:$0xff] }
 0x27d   : > { %v2496_v4 = vmul.f32 %v2067_v47, %v926_v0  ;;  %1867 = vmatpush1.bf16.msra.mxu1 %v1866_v53  ;;  %1931 = vmatpush1.bf16.msra.mxu0 %v1930_v54  ;;  %v1034_v47 = vld [vmem:[#allocation3 + $0x328] sm:$0xff]  ;;  %v1044_v53 = vld [vmem:[#allocation3 + $0x378] sm:$0xff]  ;;  %v1886_v54 = vpack.c.bf16 %v1025_v49, %v1017_v43  ;;  %v1105_v43 = vld [vmem:[#allocation3 + $0x560] sm:$0xff]  ;;  %v1904_v49 = vpack.c.bf16 %v1106_v37, %v1098_v36 }
 0x27e   : > { %1869 = vmatprep.subr.bf16.mxu1 %v1868_v56  ;;  %1933 = vmatprep.subr.bf16.mxu0 %v1932_v57  ;;  %v1033_v56 = vld [vmem:[#allocation3 + $0x320] sm:$0xff]  ;;  %v1888_v58 = vpack.c.bf16 %v1042_v50, %v1034_v47  ;;  %v1058_v0 = vld [vmem:[#allocation3 + $0x3e8] sm:$0xff]  ;;  %v1116_v50 = vld [vmem:[#allocation3 + $0x5b8] sm:$0xff] }
 0x27f   : > { %1259 = vmatprep.mubr.f32.mxu1 %v2496_v4  ;;  %1336 = vmatprep.mubr.f32.mxu0 %v2496_v4  ;;  %v1041_v57 = vld [vmem:[#allocation3 + $0x360] sm:$0xff]  ;;  %v1892_v8 = vpack.c.bf16 %v1058_v0, %v1050_v62  ;;  %v1122_v47 = vld [vmem:[#allocation3 + $0x5e8] sm:$0xff]  ;;  %v1132_v0 = vld [vmem:[#allocation3 + $0x638] sm:$0xff] }
 0x280   : > { %1260 = vmatmul.mubr.f32.gmra.mrb[6].mxu1 %v2492_v63  ;;  %1337 = vmatmul.mubr.f32.gmra.mrb[66].mxu0 %v2492_v63  ;;  %v1890_v3 = vpack.c.bf16 %v1041_v57, %v1033_v56  ;;  %v1121_v56 = vld [vmem:[#allocation3 + $0x5e0] sm:$0xff]  ;;  %v1908_v57 = vpack.c.bf16 %v1122_v47, %v1114_v46  ;;  %v1138_v62 = vld [vmem:[#allocation3 + $0x668] sm:$0xff]  ;;  %v1180_v37 = vld [vmem:[#allocation3 + $0x7b8] sm:$0xff] }
 0x281   : > { %1871 = vmatpush1.bf16.msra.mxu1 %v1870_v5  ;;  %1935 = vmatpush1.bf16.msra.mxu0 %v1934_v6  ;;  %v1954_v5 = vpack.c.bf16 %v1043_v61, %v1035_v60  ;;  %v1049_v6 = vld [vmem:[#allocation3 + $0x3a0] sm:$0xff]  ;;  %v1123_v60 = vld [vmem:[#allocation3 + $0x5f0] sm:$0xff]  ;;  %v1130_v61 = vld [vmem:[#allocation3 + $0x628] sm:$0xff] }
 0x282   : > { %1407 = vmatprep.mubr.f32.mxu1 %v930_v51  ;;  %1484 = vmatprep.mubr.f32.mxu0 %v930_v51  ;;  %v1036_v51 = vld [vmem:[#allocation3 + $0x338] sm:$0xff]  ;;  %v1894_v16 = vpack.c.bf16 %v1057_v7, %v1049_v6  ;;  %v1137_v6 = vld [vmem:[#allocation3 + $0x660] sm:$0xff]  ;;  %v1912_v7 = vpack.c.bf16 %v1138_v62, %v1130_v61  ;;  %v1186_v36 = vld [vmem:[#allocation3 + $0x7e8] sm:$0xff] }
 0x283   : > { %1873 = vmatprep.subr.bf16.mxu1 %v1872_v12  ;;  %1937 = vmatprep.subr.bf16.mxu0 %v1936_v13  ;;  %v1952_v59 = vpack.c.bf16 %v1044_v53, %v1036_v51  ;;  %v1066_v12 = vld [vmem:[#allocation3 + $0x428] sm:$0xff]  ;;  %v1124_v51 = vld [vmem:[#allocation3 + $0x5f8] sm:$0xff] }
 0x284   : > { %v1074_v13 = vld [vmem:[#allocation3 + $0x468] sm:$0xff] }
 0x285   : > { %1875 = vmatpush1.bf16.msra.mxu1 %v1874_v17  ;;  %1939 = vmatpush1.bf16.msra.mxu0 %v1938_v18  ;;  %v1958_v17 = vpack.c.bf16 %v1059_v11, %v1051_v10  ;;  %v1065_v18 = vld [vmem:[#allocation3 + $0x420] sm:$0xff]  ;;  %v1896_v20 = vpack.c.bf16 %v1074_v13, %v1066_v12  ;;  %v1139_v10 = vld [vmem:[#allocation3 + $0x670] sm:$0xff]  ;;  %v1146_v11 = vld [vmem:[#allocation3 + $0x6a8] sm:$0xff] }
 0x286   : > { %1877 = vmatprep.subr.bf16.mxu1 %v1876_v21  ;;  %1941 = vmatprep.subr.bf16.mxu0 %v1940_v22  ;;  %v1960_v21 = vpack.c.bf16 %v1076_v15, %v1068_v14  ;;  %v1067_v22 = vld [vmem:[#allocation3 + $0x430] sm:$0xff]  ;;  %v1898_v28 = vpack.c.bf16 %v1073_v19, %v1065_v18  ;;  %v1154_v12 = vld [vmem:[#allocation3 + $0x6e8] sm:$0xff]  ;;  %v1148_v13 = vld [vmem:[#allocation3 + $0x6b8] sm:$0xff] }
 0x287   : > { %v1156_v14 = vld [vmem:[#allocation3 + $0x6f8] sm:$0xff]  ;;  %v1153_v18 = vld [vmem:[#allocation3 + $0x6e0] sm:$0xff]  ;;  %v1916_v19 = vpack.c.bf16 %v1154_v12, %v1146_v11 }
 0x289   : > { %1879 = vmatpush1.bf16.msra.mxu1 %v1878_v29  ;;  %1943 = vmatpush1.bf16.msra.mxu0 %v1942_v30  ;;  %v1962_v29 = vpack.c.bf16 %v1075_v23, %v1067_v22  ;;  %v1081_v30 = vld [vmem:[#allocation3 + $0x4a0] sm:$0xff]  ;;  %v1155_v22 = vld [vmem:[#allocation3 + $0x6f0] sm:$0xff]  ;;  %v1162_v23 = vld [vmem:[#allocation3 + $0x728] sm:$0xff] }
 0x28a   : > { %1881 = vmatprep.subr.bf16.mxu1 %v1880_v33  ;;  %1945 = vmatprep.subr.bf16.mxu0 %v1944_v34  ;;  %v1964_v33 = vpack.c.bf16 %v1092_v27, %v1084_v26  ;;  %v1083_v34 = vld [vmem:[#allocation3 + $0x4b0] sm:$0xff]  ;;  %v1902_v40 = vpack.c.bf16 %v1089_v31, %v1081_v30  ;;  %v1172_v26 = vld [vmem:[#allocation3 + $0x778] sm:$0xff]  ;;  %v1169_v30 = vld [vmem:[#allocation3 + $0x760] sm:$0xff]  ;;  %v1920_v31 = vpack.c.bf16 %v1170_v24, %v1162_v23 }
 0x28d   : > { %1883 = vmatpush1.bf16.msra.mxu1 %v1882_v41  ;;  %1947 = vmatpush1.bf16.msra.mxu0 %v1946_v42  ;;  %v1966_v41 = vpack.c.bf16 %v1091_v35, %v1083_v34  ;;  %v1097_v42 = vld [vmem:[#allocation3 + $0x520] sm:$0xff]  ;;  %v1171_v34 = vld [vmem:[#allocation3 + $0x770] sm:$0xff]  ;;  %v1178_v35 = vld [vmem:[#allocation3 + $0x7a8] sm:$0xff] }
 0x28e   : > { %1885 = vmatprep.subr.bf16.mxu1 %v1884_v44  ;;  %1949 = vmatprep.subr.bf16.mxu0 %v1948_v52  ;;  %v1968_v44 = vpack.c.bf16 %v1108_v39, %v1100_v38  ;;  %v1099_v52 = vld [vmem:[#allocation3 + $0x530] sm:$0xff]  ;;  %v1906_v53 = vpack.c.bf16 %v1105_v43, %v1097_v42  ;;  %v1188_v38 = vld [vmem:[#allocation3 + $0x7f8] sm:$0xff]  ;;  %v1924_v42 = vpack.c.bf16 %v1186_v36, %v1178_v35 }
 0x28f   : > { %v1988_v43 = vpack.c.bf16 %v1188_v38, %v1180_v37 }
 0x291   : > { %1887 = vmatpush1.bf16.msra.mxu1 %v1886_v54  ;;  %1951 = vmatpush1.bf16.msra.mxu0 %v1950_v55  ;;  %v1970_v54 = vpack.c.bf16 %v1107_v45, %v1099_v52  ;;  %v1113_v55 = vld [vmem:[#allocation3 + $0x5a0] sm:$0xff]  ;;  %v1187_v52 = vld [vmem:[#allocation3 + $0x7f0] sm:$0xff] }
 0x292   : > { %1889 = vmatprep.subr.bf16.mxu1 %v1888_v58  ;;  %1953 = vmatprep.subr.bf16.mxu0 %v1952_v59  ;;  %v1972_v58 = vpack.c.bf16 %v1124_v51, %v1116_v50  ;;  %v1115_v59 = vld [vmem:[#allocation3 + $0x5b0] sm:$0xff]  ;;  %v1910_v2 = vpack.c.bf16 %v1121_v56, %v1113_v55 }
 0x295   : > { %1891 = vmatpush1.bf16.msra.mxu1 %v1890_v3  ;;  %1955 = vmatpush1.bf16.msra.mxu0 %v1954_v5  ;;  %v1974_v3 = vpack.c.bf16 %v1123_v60, %v1115_v59  ;;  %v1129_v5 = vld [vmem:[#allocation3 + $0x620] sm:$0xff] }
 0x296   : > { %1893 = vmatprep.subr.bf16.mxu1 %v1892_v8  ;;  %1957 = vmatprep.subr.bf16.mxu0 %v1956_v9  ;;  %v1976_v8 = vpack.c.bf16 %v1140_v1, %v1132_v0  ;;  %v1131_v9 = vld [vmem:[#allocation3 + $0x630] sm:$0xff]  ;;  %v1914_v15 = vpack.c.bf16 %v1137_v6, %v1129_v5 }
 0x299   : > { %1895 = vmatpush1.bf16.msra.mxu1 %v1894_v16  ;;  %1959 = vmatpush1.bf16.msra.mxu0 %v1958_v17  ;;  %v1978_v16 = vpack.c.bf16 %v1139_v10, %v1131_v9  ;;  %v1145_v17 = vld [vmem:[#allocation3 + $0x6a0] sm:$0xff] }
 0x29a   : > { %1897 = vmatprep.subr.bf16.mxu1 %v1896_v20  ;;  %1961 = vmatprep.subr.bf16.mxu0 %v1960_v21  ;;  %v1980_v20 = vpack.c.bf16 %v1156_v14, %v1148_v13  ;;  %v1147_v21 = vld [vmem:[#allocation3 + $0x6b0] sm:$0xff]  ;;  %v1918_v27 = vpack.c.bf16 %v1153_v18, %v1145_v17 }
 0x29d   : > { %1899 = vmatpush1.bf16.msra.mxu1 %v1898_v28  ;;  %1963 = vmatpush1.bf16.msra.mxu0 %v1962_v29  ;;  %v1982_v28 = vpack.c.bf16 %v1155_v22, %v1147_v21  ;;  %v1161_v29 = vld [vmem:[#allocation3 + $0x720] sm:$0xff] }
 0x29e   : > { %1901 = vmatprep.subr.bf16.mxu1 %v1900_v32  ;;  %1965 = vmatprep.subr.bf16.mxu0 %v1964_v33  ;;  %v1984_v32 = vpack.c.bf16 %v1172_v26, %v1164_v25  ;;  %v1163_v33 = vld [vmem:[#allocation3 + $0x730] sm:$0xff]  ;;  %v1922_v39 = vpack.c.bf16 %v1169_v30, %v1161_v29 }
 0x2a1   : > { %1903 = vmatpush1.bf16.msra.mxu1 %v1902_v40  ;;  %1967 = vmatpush1.bf16.msra.mxu0 %v1966_v41  ;;  %v1986_v40 = vpack.c.bf16 %v1171_v34, %v1163_v33  ;;  %v1177_v41 = vld [vmem:[#allocation3 + $0x7a0] sm:$0xff] }
 0x2a2   : > { %1905 = vmatprep.subr.bf16.mxu1 %v1904_v49  ;;  %1969 = vmatprep.subr.bf16.mxu0 %v1968_v44  ;;  %v1185_v49 = vld [vmem:[#allocation3 + $0x7e0] sm:$0xff]  ;;  %v1179_v44 = vld [vmem:[#allocation3 + $0x7b0] sm:$0xff] }
 0x2a3   : > { %v1926_v45 = vpack.c.bf16 %v1185_v49, %v1177_v41  ;;  %v1990_v46 = vpack.c.bf16 %v1187_v52, %v1179_v44 }
 0x2a5   : > { %1907 = vmatpush1.bf16.msra.mxu1 %v1906_v53  ;;  %1971 = vmatpush1.bf16.msra.mxu0 %v1970_v54 }
 0x2a6   : > { %1909 = vmatprep.subr.bf16.mxu1 %v1908_v57  ;;  %1973 = vmatprep.subr.bf16.mxu0 %v1972_v58 }
 0x2a9   : > { %1911 = vmatpush1.bf16.msra.mxu1 %v1910_v2  ;;  %1975 = vmatpush1.bf16.msra.mxu0 %v1974_v3 }
 0x2aa   : > { %1913 = vmatprep.subr.bf16.mxu1 %v1912_v7  ;;  %1977 = vmatprep.subr.bf16.mxu0 %v1976_v8 }
 0x2ad   : > { %1915 = vmatpush1.bf16.msra.mxu1 %v1914_v15  ;;  %1979 = vmatpush1.bf16.msra.mxu0 %v1978_v16 }
 0x2ae   : > { %1917 = vmatprep.subr.bf16.mxu1 %v1916_v19  ;;  %1981 = vmatprep.subr.bf16.mxu0 %v1980_v20 }
 0x2b1   : > { %1919 = vmatpush1.bf16.msra.mxu1 %v1918_v27  ;;  %1983 = vmatpush1.bf16.msra.mxu0 %v1982_v28 }
 0x2b2   : > { %1921 = vmatprep.subr.bf16.mxu1 %v1920_v31  ;;  %1985 = vmatprep.subr.bf16.mxu0 %v1984_v32 }
 0x2b5   : > { %1923 = vmatpush1.bf16.msra.mxu1 %v1922_v39  ;;  %1987 = vmatpush1.bf16.msra.mxu0 %v1986_v40 }
 0x2b6   : > { %1925 = vmatprep.subr.bf16.mxu1 %v1924_v42  ;;  %1989 = vmatprep.subr.bf16.mxu0 %v1988_v43 }
 0x2b9   : > { %1927 = vmatpush1.bf16.msra.mxu1 %v1926_v45  ;;  %1991 = vmatpush1.bf16.msra.mxu0 %v1990_v46 }
 0x2bc   : > { %1408 = vmatmul.mubr.f32.vlgmr.msra.gmra.mrb[8].mxu1 %v2490_v48  ;;  %1485 = vmatmul.mubr.f32.vlgmr.msra.gmra.mrb[68].mxu0 %v2490_v48 }
 0x2bd   : > { %1413 = vmatprep.mubr.f32.mxu1 %v2496_v4  ;;  %1490 = vmatprep.mubr.f32.mxu0 %v2496_v4 }
 0x2c0   : > { %1414 = vmatmul.mubr.f32.gmra.mrb[10].mxu1 %v2492_v63  ;;  %1491 = vmatmul.mubr.f32.gmra.mrb[70].mxu0 %v2492_v63 }
 0x34f   : > { %v1255_v47 = vpop.f32.mrb[4].mxu1  ;;  %v1332_v50 = vpop.f32.mrb[64].mxu0 }
 0x350   : > { %1497 = vst [vmem:[%s2511_s5] sm:$0xff] %v1255_v47  ;;  %1499 = vst [vmem:[%s2511_s5 + $0x10] sm:$0xff] %v1332_v50  ;;  %v1257_v48 = vpop.f32.mrb[5].mxu1  ;;  %v1334_v63 = vpop.f32.mrb[65].mxu0 }
 0x351   : > { %1498 = vst [vmem:[%s2511_s5 + $0x8] sm:$0xff] %v1257_v48  ;;  %1500 = vst [vmem:[%s2511_s5 + $0x18] sm:$0xff] %v1334_v63 }
 0x353   : > { %v1261_v4 = vpop.f32.mrb[6].mxu1  ;;  %v1338_v51 = vpop.f32.mrb[66].mxu0 }
 0x354   : > { %1505 = vst [vmem:[%s2511_s5 + $0x40] sm:$0xff] %v1261_v4  ;;  %1507 = vst [vmem:[%s2511_s5 + $0x50] sm:$0xff] %v1338_v51  ;;  %v1263_v53 = vpop.f32.mrb[7].mxu1  ;;  %v1340_v54 = vpop.f32.mrb[67].mxu0 }
 0x355   : > { %1506 = vst [vmem:[%s2511_s5 + $0x48] sm:$0xff] %v1263_v53  ;;  %1508 = vst [vmem:[%s2511_s5 + $0x58] sm:$0xff] %v1340_v54 }
 0x38f   : > { %v1409_v55 = vpop.f32.mrb[8].mxu1  ;;  %v1486_v56 = vpop.f32.mrb[68].mxu0 }
 0x390   : > { %1501 = vst [vmem:[%s2511_s5 + $0x20] sm:$0xff] %v1409_v55  ;;  %1503 = vst [vmem:[%s2511_s5 + $0x30] sm:$0xff] %v1486_v56  ;;  %v1411_v57 = vpop.f32.mrb[9].mxu1  ;;  %v1488_v58 = vpop.f32.mrb[69].mxu0 }
 0x391   : > { %1502 = vst [vmem:[%s2511_s5 + $0x28] sm:$0xff] %v1411_v57  ;;  %1504 = vst [vmem:[%s2511_s5 + $0x38] sm:$0xff] %v1488_v58 }
 0x393   : > { %v1415_v59 = vpop.f32.mrb[10].mxu1  ;;  %v1492_v60 = vpop.f32.mrb[70].mxu0 }
 0x394   : > { %1509 = vst [vmem:[%s2511_s5 + $0x60] sm:$0xff] %v1415_v59  ;;  %1511 = vst [vmem:[%s2511_s5 + $0x70] sm:$0xff] %v1492_v60  ;;  %v1417_v61 = vpop.f32.mrb[11].mxu1  ;;  %v1494_v62 = vpop.f32.mrb[71].mxu0 }
 0x395   : > { %1510 = vst [vmem:[%s2511_s5 + $0x68] sm:$0xff] %v1417_v61  ;;  %1512 = vst [vmem:[%s2511_s5 + $0x78] sm:$0xff] %v1494_v62 }
 0x396   : > { %2109 = shalt.err (!%p2106_p6)
}
 0x397   : > { %s2110_s13 = scalar_lea.hbm %s2530_s6, 2048  ;;  %s2114_s22 = scalar_lea.hbm %s2590_s4, 4096 }
 0x398   : > { %p2111_p7 = scmp.ne.s32.totalorder %s2530_s6, %s2110_s13  ;;  %p2115_p0 = scmp.lt.u32.totalorder %s2530_s6, %s2590_s4 }
 0x399   : > { %p2116_p2 = scmp.lt.u32.totalorder %s2114_s22, %s2110_s13  ;;  %p2118_p8 = scmp.lt.u32.totalorder %s2110_s13, %s2530_s6 }
 0x39a   : > { %p2112_p9 = pnand %p2111_p7, %p2602_p10 }
 0x39b   : > { %p2117_p4 = por %p2116_p2, %p2115_p0 }
 0x39c   : > { %p2113_p12 = pneg %p2112_p9 }
 0x39d   : > { %p2119_p11 = por %p2118_p8, %p2117_p4 }
 0x39f   : > { %p2120_p13 = pnand %p2119_p11, %p2113_p12 }
 0x3a1   : > { %2123 = shalt.err (!%p2120_p13)
}
 0x3a2   : > { %s2185_s5 = smov 1024   ;;  %s2186_s7 = smov 64  }
 0x3a3   : > { %1997 = dma.vmem_to_hbm [thread:$0]  (%p2602_p10), %s2532_s8, 2048, %s2530_s6, %s2540_s18, %s2185_s5, %s2185_s5, %s2186_s7  }
 0x3a4 PF: > { %p2009_p1 = scmp.ge.s32.totalorder %s2178_s20, 2  ;;  %s1542_s9 = sand.u32 1, %s2158_s15  }
 0x3a5   : > { %p2603_p3 = scmp.ne.s32.totalorder %s2596_s27, 0  ;;  %s1543_s10 = scalar_lea.sflag [#allocation5], %s1542_s9 }
 0x3a7   : > { %p2004_p5 = pnand %p2009_p1, %p2603_p3 }
 0x3a9   : > { %2153 = dma.done.wait (!%p2004_p5), %s1543_s10, 2048  }
 0x3aa   : > { %2155 = vsyncadd (!%p2004_p5), %s1543_s10, 4294965248  ;;  %s18_s20 = sadd.s32 1, %s2178_s20   ;;  %s2604_s15 = smov %s2162_s16 }
 0x3ab   : > { %p15_p6 = scmp.ge.s32.totalorder %s18_s20, 4   ;;  %s2605_s16 = smov %s2166_s17 }
 0x3ac   : > { %s2606_s17 = smov %s2265_s28  ;;  %s2607_s18 = smov %s2174_s19 }
 0x3ad   : > { %s2608_s19 = smov %s2610_s23  ;;  %17 = sbr.rel (!%p15_p6) target bundleno = 5 (0x5), region = 76 }
 0x3b4   :  { %1548 = vsyncpa [#allocation4], 1 }
 0x3b5   :  { %1550 = vsyncpa [#allocation4 + $0x1], 1 }
 0x3b6   :  { %1551 = vsyncpa [#allocation5], 1 }
 0x3b7   :  { %1553 = vsyncpa [#allocation5 + $0x1], 1 }

</bundles_post_ra>
